<compile_context>
chip_gen: v7x
topology: tpu7x:2x2x1
jax: 0.10.0
libtpu: 0.0.40
codegen_flags: <defaults>
</compile_context>

<pallas_src>
import functools

import jax
import jax.numpy as jnp
from jax.experimental import pallas as pl
from jax.experimental.pallas import tpu as pltpu


def _make_disc_kernel(bf16_epilogue: bool):
    def _disc_kernel(xa_ref, w1_ref, b1_ref, w2_ref, b2_ref, w3_ref, b3_ref,
                     o_ref):
        # fc1: one MXU matmul over the concatenated [x, action] tile.
        h1 = jnp.dot(xa_ref[...], w1_ref[...],
                     preferred_element_type=jnp.float32)
        if bf16_epilogue:
            # bf16 bias-add + ReLU (v6e/v7x: halves vreg count on the VALU slot).
            h1 = jnp.maximum(h1.astype(jnp.bfloat16) + b1_ref[...], 0.0)
        else:
            # v5-class chips: keep elementwise math in f32, cast once for fc2.
            h1 = jnp.maximum(h1 + b1_ref[...], 0.0).astype(jnp.bfloat16)

        # fc2 + ReLU (bf16 operands, f32 accumulate).
        h2 = jnp.dot(h1, w2_ref[...],
                     preferred_element_type=jnp.float32) + b2_ref[...]
        h2 = jnp.maximum(h2, 0.0)

        # fc3: output width 1 -> VPU multiply + XLU lane reduction.
        logits = jnp.sum(h2 * w3_ref[...], axis=-1, keepdims=True) + b3_ref[...]

        # Folded affine: (tanh + 1) * 0.48 + 0.01 == tanh * 0.48 + 0.49.
        o_ref[...] = (jnp.tanh(logits) * 0.48 + 0.49).astype(o_ref.dtype)

    return _disc_kernel


def _default_bf16_epilogue() -> bool:
    """bf16 elementwise epilogue only on chips with a bf16-capable VPU."""
    try:
        kind = jax.devices()[0].device_kind.lower()
    except Exception:  # pragma: no cover - be conservative if detection fails
        return False
    return not any(tag in kind for tag in ("v2", "v3", "v4", "v5"))


def _pick_batch_tile(B: int, batch_tile: int) -> int:
    """Clamp the batch tile: >=2 grid steps when possible (v7x megacore),
    sublane-aligned, and never larger than needed."""
    TB = int(batch_tile)
    if B > 2 * 128:
        # ~ceil(B/2) rounded up to 128 rows -> at least 2 grid steps.
        half = ((B + 1) // 2 + 127) // 128 * 128
        TB = min(TB, half)
    else:
        TB = min(TB, max(8, ((B + 7) // 8) * 8))
    return max(TB, 8)


def discriminator_forward(x, action, params, *, batch_tile=4096,
                          bf16_epilogue=None):
    """x: (B, obs) f32, action: (B, act) f32 -> (B, 1) f32."""
    w1, b1, w2, b2, w3, b3 = params
    B, obs = x.shape
    act = action.shape[1]
    in_dim = obs + act
    hidden = w1.shape[1]
    assert w1.shape == (in_dim, hidden)
    assert w3.reshape(-1).shape[0] == hidden and w3.shape[0] == hidden, (
        "w3 must be a (hidden, 1) column")

    if bf16_epilogue is None:
        bf16_epilogue = _default_bf16_epilogue()

    TB = _pick_batch_tile(B, batch_tile)
    B_pad = pl.cdiv(B, TB) * TB

    # Single fused pre-pass over the inputs: concat + pad + bf16 cast.
    xa = jnp.concatenate([x, action], axis=1)
    if B_pad != B:
        xa = jnp.pad(xa, ((0, B_pad - B), (0, 0)))
    xa_bf = xa.astype(jnp.bfloat16)

    # Weights/biases prepared once; bf16 operands for the MXU, f32 accumulate.
    w1_bf = w1.astype(jnp.bfloat16)                                   # (in_dim, hidden)
    w2_bf = w2.astype(jnp.bfloat16)                                   # (hidden, hidden)
    b1_p = b1.reshape(1, hidden).astype(
        jnp.bfloat16 if bf16_epilogue else jnp.float32)
    b2_f = b2.reshape(1, hidden).astype(jnp.float32)
    w3_row = w3.reshape(1, hidden).astype(jnp.float32)                # (1, hidden)
    b3_f = b3.reshape(1, 1).astype(jnp.float32)

    grid = (B_pad // TB,)

    # Weights/biases: constant block index -> fetched once, VMEM-resident.
    resident = lambda arr: pl.BlockSpec(arr.shape, lambda i: (0,) * arr.ndim)

    out = pl.pallas_call(
        _make_disc_kernel(bf16_epilogue),
        out_shape=jax.ShapeDtypeStruct((B_pad, 1), jnp.float32),
        grid=grid,
        in_specs=[
            pl.BlockSpec((TB, in_dim), lambda i: (i, 0)),   # streamed per tile
            resident(w1_bf), resident(b1_p),
            resident(w2_bf), resident(b2_f),
            resident(w3_row), resident(b3_f),
        ],
        out_specs=pl.BlockSpec((TB, 1), lambda i: (i, 0)),
        compiler_params=pltpu.CompilerParams(
            dimension_semantics=("parallel",),          # megacore-shard the batch
            vmem_limit_bytes=32 * 1024 * 1024,          # fits v5e/v6e/v7x budgets
        ),
    )(xa_bf, w1_bf, b1_p, w2_bf, b2_f, w3_row, b3_f)

    return out[:B]


def init_params(key, observation_size, action_size, hidden=256):
    """Deterministic synthetic parameters (shapes match the PyTorch module)."""
    k1, k2, k3 = jax.random.split(key, 3)
    in_dim = observation_size + action_size
    scale1 = 1.0 / jnp.sqrt(in_dim)
    scale2 = 1.0 / jnp.sqrt(hidden)
    w1 = jax.random.uniform(k1, (in_dim, hidden), jnp.float32, -scale1, scale1)
    b1 = jnp.zeros((1, hidden), jnp.float32)
    w2 = jax.random.uniform(k2, (hidden, hidden), jnp.float32, -scale2, scale2)
    b2 = jnp.zeros((1, hidden), jnp.float32)
    w3 = jax.random.uniform(k3, (hidden, 1), jnp.float32, -scale2, scale2)
    b3 = jnp.zeros((1, 1), jnp.float32)
    return (w1, b1, w2, b2, w3, b3)


def reference_forward(x, action, params):
    """Pure-f32 reference (matches the PyTorch module exactly)."""
    w1, b1, w2, b2, w3, b3 = params
    xa = jnp.concatenate([x, action], axis=1)
    h = jnp.maximum(xa @ w1 + b1, 0.0)
    h = jnp.maximum(h @ w2 + b2, 0.0)
    return (jnp.tanh(h @ w3 + b3) + 1.0) * 0.48 + 0.01


def reference_forward_bf16(x, action, params):
    """Reference with the same bf16-operand / f32-accumulate quantization."""
    w1, b1, w2, b2, w3, b3 = params
    xa = jnp.concatenate([x, action], axis=1).astype(jnp.bfloat16)
    h = jnp.dot(xa, w1.astype(jnp.bfloat16),
                preferred_element_type=jnp.float32) + b1
    h = jnp.maximum(h, 0.0).astype(jnp.bfloat16)
    h = jnp.dot(h, w2.astype(jnp.bfloat16),
                preferred_element_type=jnp.float32) + b2
    h = jnp.maximum(h, 0.0)
    return (jnp.tanh(h @ w3 + b3) + 1.0) * 0.48 + 0.01


if __name__ == "__main__":
    observation_size = 12
    action_size = 4
    batch = 300   # exercises >=2 grid steps + ragged-tail padding

    key = jax.random.PRNGKey(0)
    kx, ka, kp = jax.random.split(key, 3)

    x = jax.random.normal(kx, (batch, observation_size), jnp.float32)
    action = jax.random.normal(ka, (batch, action_size), jnp.float32)
    params = init_params(kp, observation_size, action_size)

    ref_bf16 = reference_forward_bf16(x, action, params)
    ref_f32 = reference_forward(x, action, params)

    # Default (auto-clamped) tile and an explicit small tile (more grid steps).
    for tile in (4096, 128):
        out = discriminator_forward(x, action, params, batch_tile=tile)
        out = jax.block_until_ready(out)
        assert out.shape == (batch, 1), out.shape
        # Tight check against the bf16-matched reference, loose sanity vs f32.
        assert jnp.allclose(out, ref_bf16, atol=5e-3, rtol=5e-3), \
            float(jnp.max(jnp.abs(out - ref_bf16)))
        assert float(jnp.max(jnp.abs(out - ref_f32))) < 5e-2

    print("KERNEL_OK")
</pallas_src>

<mosaic_0001>
module attributes {stable_mosaic.version = 11 : i64} {
  func.func @_disc_kernel(%arg0: i32, %arg1: memref<256x16xbf16, #tpu.memory_space<vmem>>, %arg2: memref<16x256xbf16, #tpu.memory_space<vmem>>, %arg3: memref<1x256xbf16, #tpu.memory_space<vmem>>, %arg4: memref<256x256xbf16, #tpu.memory_space<vmem>>, %arg5: memref<1x256xf32, #tpu.memory_space<vmem>>, %arg6: memref<1x256xf32, #tpu.memory_space<vmem>>, %arg7: memref<1x1xf32, #tpu.memory_space<vmem>>, %arg8: memref<256x1xf32, #tpu.memory_space<vmem>>) attributes {dimension_semantics = [#tpu.dimension_semantics<parallel>], iteration_bounds = array<i64: 2>, scalar_prefetch = 0 : i64, scratch_operands = 0 : i64, tpu.core_type = #tpu.core_type<tc>, window_params = [{transform_indices = @transform_0, window_bounds = array<i64: 256, 16>}, {pipeline_mode = #tpu.pipeline_mode<synchronous>, transform_indices = @transform_1, window_bounds = array<i64: 16, 256>}, {pipeline_mode = #tpu.pipeline_mode<synchronous>, transform_indices = @transform_2, window_bounds = array<i64: 1, 256>}, {pipeline_mode = #tpu.pipeline_mode<synchronous>, transform_indices = @transform_3, window_bounds = array<i64: 256, 256>}, {pipeline_mode = #tpu.pipeline_mode<synchronous>, transform_indices = @transform_4, window_bounds = array<i64: 1, 256>}, {pipeline_mode = #tpu.pipeline_mode<synchronous>, transform_indices = @transform_5, window_bounds = array<i64: 1, 256>}, {pipeline_mode = #tpu.pipeline_mode<synchronous>, transform_indices = @transform_6, window_bounds = array<i64: 1, 1>}, {transform_indices = @transform_7, window_bounds = array<i64: 256, 1>}]} {
    %c0 = arith.constant 0 : index
    %c0_0 = arith.constant 0 : index
    %0 = vector.load %arg1[%c0, %c0_0] : memref<256x16xbf16, #tpu.memory_space<vmem>>, vector<256x16xbf16>
    %c0_1 = arith.constant 0 : index
    %c0_2 = arith.constant 0 : index
    %1 = vector.load %arg2[%c0_1, %c0_2] : memref<16x256xbf16, #tpu.memory_space<vmem>>, vector<16x256xbf16>
    %cst = arith.constant dense<0.000000e+00> : vector<256x256xf32>
    %2 = tpu.matmul %0, %1, %cst {dimension_numbers = #tpu.dot_dimension_numbers<[1], [0], [0], [1], [0, 0, 1, 1], [], []>} : vector<256x16xbf16>, vector<16x256xbf16>, vector<256x256xf32> -> vector<256x256xf32>
    %3 = arith.truncf %2 : vector<256x256xf32> to vector<256x256xbf16>
    %c0_3 = arith.constant 0 : index
    %c0_4 = arith.constant 0 : index
    %4 = vector.load %arg3[%c0_3, %c0_4] : memref<1x256xbf16, #tpu.memory_space<vmem>>, vector<1x256xbf16>
    %5 = vector.broadcast %4 : vector<1x256xbf16> to vector<256x256xbf16>
    %6 = arith.addf %3, %5 : vector<256x256xbf16>
    %cst_5 = arith.constant 0.000000e+00 : bf16
    %7 = vector.broadcast %cst_5 : bf16 to vector<256x256xbf16>
    %8 = arith.maximumf %6, %7 : vector<256x256xbf16>
    %c0_6 = arith.constant 0 : index
    %c0_7 = arith.constant 0 : index
    %9 = vector.load %arg4[%c0_6, %c0_7] : memref<256x256xbf16, #tpu.memory_space<vmem>>, vector<256x256xbf16>
    %cst_8 = arith.constant dense<0.000000e+00> : vector<256x256xf32>
    %10 = tpu.matmul %8, %9, %cst_8 {dimension_numbers = #tpu.dot_dimension_numbers<[1], [0], [0], [1], [0, 0, 1, 1], [], []>} : vector<256x256xbf16>, vector<256x256xbf16>, vector<256x256xf32> -> vector<256x256xf32>
    %c0_9 = arith.constant 0 : index
    %c0_10 = arith.constant 0 : index
    %11 = vector.load %arg5[%c0_9, %c0_10] : memref<1x256xf32, #tpu.memory_space<vmem>>, vector<1x256xf32>
    %12 = vector.broadcast %11 : vector<1x256xf32> to vector<256x256xf32>
    %13 = arith.addf %10, %12 : vector<256x256xf32>
    %cst_11 = arith.constant 0.000000e+00 : f32
    %14 = vector.broadcast %cst_11 : f32 to vector<256x256xf32>
    %15 = arith.maximumf %13, %14 : vector<256x256xf32>
    %c0_12 = arith.constant 0 : index
    %c0_13 = arith.constant 0 : index
    %16 = vector.load %arg6[%c0_12, %c0_13] : memref<1x256xf32, #tpu.memory_space<vmem>>, vector<1x256xf32>
    %17 = vector.broadcast %16 : vector<1x256xf32> to vector<256x256xf32>
    %18 = arith.mulf %15, %17 : vector<256x256xf32>
    %cst_14 = arith.constant dense<0.000000e+00> : vector<256xf32>
    %19 = vector.multi_reduction <add>, %18, %cst_14 [1] : vector<256x256xf32> to vector<256xf32>
    %20 = vector.shape_cast %19 : vector<256xf32> to vector<256x1xf32>
    %c0_15 = arith.constant 0 : index
    %c0_16 = arith.constant 0 : index
    %21 = vector.load %arg7[%c0_15, %c0_16] : memref<1x1xf32, #tpu.memory_space<vmem>>, vector<1x1xf32>
    %22 = vector.broadcast %21 : vector<1x1xf32> to vector<256x1xf32>
    %23 = arith.addf %20, %22 : vector<256x1xf32>
    %24 = math.tanh %23 : vector<256x1xf32>
    %cst_17 = arith.constant 4.800000e-01 : f32
    %25 = vector.broadcast %cst_17 : f32 to vector<256x1xf32>
    %26 = arith.mulf %24, %25 : vector<256x1xf32>
    %cst_18 = arith.constant 4.900000e-01 : f32
    %27 = vector.broadcast %cst_18 : f32 to vector<256x1xf32>
    %28 = arith.addf %26, %27 : vector<256x1xf32>
    %c0_19 = arith.constant 0 : index
    %c0_20 = arith.constant 0 : index
    %29 = vector.load %arg8[%c0_19, %c0_20] : memref<256x1xf32, #tpu.memory_space<vmem>>, vector<256x1xf32>
    tpu.vector_store %arg8[%c0_19, %c0_20], %28 {strides = array<i32>} : memref<256x1xf32, #tpu.memory_space<vmem>>, vector<256x1xf32>,
    return
  }
  func.func @transform_0(%arg0: i32) -> (i32, i32) {
    %c0_i32 = arith.constant 0 : i32
    %c0_i32_0 = arith.constant 0 : i32
    return %arg0, %c0_i32 : i32, i32
  }
  func.func @transform_1(%arg0: i32) -> (i32, i32) {
    %c0_i32 = arith.constant 0 : i32
    %c0_i32_0 = arith.constant 0 : i32
    %c0_i32_1 = arith.constant 0 : i32
    return %c0_i32, %c0_i32_0 : i32, i32
  }
  func.func @transform_2(%arg0: i32) -> (i32, i32) {
    %c0_i32 = arith.constant 0 : i32
    %c0_i32_0 = arith.constant 0 : i32
    %c0_i32_1 = arith.constant 0 : i32
    return %c0_i32, %c0_i32_0 : i32, i32
  }
  func.func @transform_3(%arg0: i32) -> (i32, i32) {
    %c0_i32 = arith.constant 0 : i32
    %c0_i32_0 = arith.constant 0 : i32
    %c0_i32_1 = arith.constant 0 : i32
    return %c0_i32, %c0_i32_0 : i32, i32
  }
  func.func @transform_4(%arg0: i32) -> (i32, i32) {
    %c0_i32 = arith.constant 0 : i32
    %c0_i32_0 = arith.constant 0 : i32
    %c0_i32_1 = arith.constant 0 : i32
    return %c0_i32, %c0_i32_0 : i32, i32
  }
  func.func @transform_5(%arg0: i32) -> (i32, i32) {
    %c0_i32 = arith.constant 0 : i32
    %c0_i32_0 = arith.constant 0 : i32
    %c0_i32_1 = arith.constant 0 : i32
    return %c0_i32, %c0_i32_0 : i32, i32
  }
  func.func @transform_6(%arg0: i32) -> (i32, i32) {
    %c0_i32 = arith.constant 0 : i32
    %c0_i32_0 = arith.constant 0 : i32
    %c0_i32_1 = arith.constant 0 : i32
    return %c0_i32, %c0_i32_0 : i32, i32
  }
  func.func @transform_7(%arg0: i32) -> (i32, i32) {
    %c0_i32 = arith.constant 0 : i32
    %c0_i32_0 = arith.constant 0 : i32
    return %arg0, %c0_i32 : i32, i32
  }
}

</mosaic_0001>

<bundles_post_ra>
// kernel: tpu_custom_call.1
= control target key start
LH: loop header
LB: loop body
LE: loop exit
PB: predicated region body
PF: predicated region fallthrough
CT: control target
= control target key end

     0   :  { %s1947_s26 = smov 0   ;;  %s2444_s0 = inlined_call_operand.vmem [shape: bf16[512,16], index: 0, kind: input, shape index: {}]   ;;  %s2445_s1 = inlined_call_operand.vmem [shape: bf16[16,256], index: 1, kind: input, shape index: {}]   ;;  %s2446_s2 = inlined_call_operand.vmem [shape: bf16[1,256], index: 2, kind: input, shape index: {}]   ;;  %s2447_s3 = inlined_call_operand.vmem [shape: bf16[256,256], index: 3, kind: input, shape index: {}]   ;;  %s2448_s4 = inlined_call_operand.vmem [shape: f32[1,256], index: 4, kind: input, shape index: {}]   ;;  %s2449_s5 = inlined_call_operand.vmem [shape: f32[1,256], index: 5, kind: input, shape index: {}]   ;;  %s2450_s6 = inlined_call_operand.<no memory space> [shape: f32[1,1], index: 6, kind: input, shape index: {}]   ;;  %s2451_s7 = inlined_call_operand.vmem [shape: f32[512,1], index: 7, kind: output, shape index: {}]  }
   0x1   :  { %v12_v0 = vstv %s2450_s6 }
   0x2   :  { %13 = vst [vmem:[#allocation2] sm:$0x1] %v12_v0 }
   0x3 LB: > { %s1642_s27 = sadd.s32 4294967295, %s1900_s26   ;;  %p1646_p0 = scmp.ge.s32.totalorder %s1900_s26, 1  ;;  %s1900_s26 = sphi %s1947_s26, %s19_s26  }
   0x4   : > { %p240_p1 = scmp.lt.s32.totalorder %s1900_s26, 3 }
   0x6   : > { %p241_p2 = pnand %p1646_p0, %p240_p1 }
   0x7   : > { %v1763_v1 = vld [vmem:[%s2445_s1 + $0x4] ss:$8 sps:$4 sm:$0xff] (!%p241_p2)   ;;  %s1647_s6 = sshll.u32 (!%p241_p2), %s1642_s27, 5  ;;  %v1765_v2 = vld [vmem:[%s2445_s1] ss:$8 sps:$4 sm:$0xff] (!%p241_p2)   ;;  %v1902_v3 = vmov (!%p241_p2), 0   ;;  %v696_v54 = vlaneseq (!%p241_p2) }
   0x8   : > { %244 = sbr.rel (%p241_p2) target bundleno = 744 (0x2e8), region = 48  ;;  %490 = vmatprep.mubr.bf16.mxu0 (!%p241_p2), %v1902_v3  ;;  %p273_p3 = scmp.lt.s32.totalorder (!%p241_p2), %s1647_s6, 63  ;;  %458 = vmatprep.subr.bf16.mxu0 (!%p241_p2), %v1763_v1  ;;  %v1784_v4 = vld [vmem:[%s2447_s3 + $0x4] ss:$8 sps:$4 sm:$0xff] (!%p241_p2)   ;;  %v1782_v5 = vld [vmem:[%s2447_s3] ss:$8 sps:$4 sm:$0xff] (!%p241_p2)  }
   0x9   : > { %459 = vmatpush1.bf16.msra.mxu0 (!%p241_p2), %v1765_v2  ;;  %v1787_v6 = vld [vmem:[%s2447_s3 + $0x14] ss:$8 sps:$4 sm:$0xff] (!%p241_p2)   ;;  %1721 = vmatprep.subr.bf16.mxu1 (!%p241_p2), %v1784_v4  ;;  %vm409_vm0 = vcmask (!%p241_p2), 130048   ;;  %v1785_v7 = vld [vmem:[%s2447_s3 + $0x10] ss:$8 sps:$4 sm:$0xff] (!%p241_p2)   ;;  %v2113_v56 = vshrl.u32 (!%p241_p2), %v696_v54, 7 }
   0xa   : > { %989 = vmatprep.subr.bf16.mxu0 (!%p241_p2), %v1784_v4  ;;  %1737 = vmatpush1.bf16.msra.mxu1 (!%p241_p2), %v1782_v5  ;;  %v1790_v9 = vld [vmem:[%s2447_s3 + $0x24] ss:$8 sps:$4 sm:$0xff] (!%p241_p2)   ;;  %v1788_v10 = vld [vmem:[%s2447_s3 + $0x20] ss:$8 sps:$4 sm:$0xff] (!%p241_p2)   ;;  %v1793_v11 = vld [vmem:[%s2447_s3 + $0x34] ss:$8 sps:$4 sm:$0xff] (!%p241_p2)  }
   0xb   : > { %1722 = vmatprep.subr.bf16.mxu1 (!%p241_p2), %v1787_v6  ;;  %v1791_v13 = vld [vmem:[%s2447_s3 + $0x30] ss:$8 sps:$4 sm:$0xff] (!%p241_p2)   ;;  %v1794_v15 = vld [vmem:[%s2447_s3 + $0x40] ss:$8 sps:$4 sm:$0xff] (!%p241_p2)   ;;  %v1796_v16 = vld [vmem:[%s2447_s3 + $0x44] ss:$8 sps:$4 sm:$0xff] (!%p241_p2)  }
   0xc   : > { %v1799_v17 = vld [vmem:[%s2447_s3 + $0x54] ss:$8 sps:$4 sm:$0xff] (!%p241_p2)   ;;  %v1797_v18 = vld [vmem:[%s2447_s3 + $0x50] ss:$8 sps:$4 sm:$0xff] (!%p241_p2)   ;;  %v1802_v19 = vld [vmem:[%s2447_s3 + $0x64] ss:$8 sps:$4 sm:$0xff] (!%p241_p2)  }
   0xd   : > { %v1800_v21 = vld [vmem:[%s2447_s3 + $0x60] ss:$8 sps:$4 sm:$0xff] (!%p241_p2)   ;;  %v1805_v22 = vld [vmem:[%s2447_s3 + $0x74] ss:$8 sps:$4 sm:$0xff] (!%p241_p2)   ;;  %v1803_v23 = vld [vmem:[%s2447_s3 + $0x70] ss:$8 sps:$4 sm:$0xff] (!%p241_p2)  }
   0xe   : > { %1738 = vmatpush1.bf16.msra.mxu1 (!%p241_p2), %v1785_v7  ;;  %v1808_v24 = vld [vmem:[%s2447_s3 + $0x84] ss:$8 sps:$4 sm:$0xff] (!%p241_p2)   ;;  %v1806_v26 = vld [vmem:[%s2447_s3 + $0x80] ss:$8 sps:$4 sm:$0xff] (!%p241_p2)   ;;  %v1811_v27 = vld [vmem:[%s2447_s3 + $0x94] ss:$8 sps:$4 sm:$0xff] (!%p241_p2)  }
   0xf   : > { %s2453_s6 = smov (!%p273_p3, %s1647_s6), 63  ;;  %1723 = vmatprep.subr.bf16.mxu1 %v1790_v9  ;;  %v1809_v28 = vld [vmem:[%s2447_s3 + $0x90] ss:$8 sps:$4 sm:$0xff]   ;;  %v1814_v29 = vld [vmem:[%s2447_s3 + $0xa4] ss:$8 sps:$4 sm:$0xff]   ;;  %v2120_v63 = vsub.s32 0, %v2113_v56 }
  0x10   : > { %s1648_s15 = sshll.u32 %s2453_s6, 2  ;;  %v1812_v31 = vld [vmem:[%s2447_s3 + $0xa0] ss:$8 sps:$4 sm:$0xff]   ;;  %v1817_v32 = vld [vmem:[%s2447_s3 + $0xb4] ss:$8 sps:$4 sm:$0xff]   ;;  %s1650_s19 = sshll.u32 %s2453_s6, 3 }
  0x11   : > { %s1977_s18 = scalar_lea.vmem %s2444_s0, %s1648_s15  ;;  %v1815_v33 = vld [vmem:[%s2447_s3 + $0xb0] ss:$8 sps:$4 sm:$0xff]   ;;  %v1820_v34 = vld [vmem:[%s2447_s3 + $0xc4] ss:$8 sps:$4 sm:$0xff]   ;;  %v1818_v36 = vld [vmem:[%s2447_s3 + $0xc0] ss:$8 sps:$4 sm:$0xff]   ;;  %s2347_s22 = scalar_lea.vmem %s2451_s7, %s1650_s19 }
  0x12   : > { %v1766_v8 = vld [vmem:[%s1977_s18] sm:$0xff]   ;;  %v1767_v12 = vld [vmem:[%s1977_s18 + $0x8] sm:$0xff]   ;;  %1739 = vmatpush1.bf16.msra.mxu1 %v1788_v10  ;;  %v1768_v14 = vld [vmem:[%s1977_s18 + $0x10] sm:$0xff]   ;;  %v1903_v52 = vmov 1966171168   ;;  %vm1553_vm1 = vcmask 7168  }
  0x13   : > { %1669 = vmatmul.mubr.msk.bf16.vlgmr.msra.gmra.mrb[0].mxu0 %vm409_vm0, %v1766_v8  ;;  %1724 = vmatprep.subr.bf16.mxu1 %v1793_v11  ;;  %v1769_v20 = vld [vmem:[%s1977_s18 + $0x18] sm:$0xff]   ;;  %v1770_v25 = vld [vmem:[%s1977_s18 + $0x20] sm:$0xff]   ;;  %v1771_v30 = vld [vmem:[%s1977_s18 + $0x28] sm:$0xff]   ;;  %v694_v53 = vunpack.c.l.s4 %v1903_v52 }
  0x14   : > { %500 = vmatprep.mubr.bf16.mxu0 %v1902_v3  ;;  %990 = vmatpush1.bf16.msra.mxu0 %v1782_v5  ;;  %v1772_v35 = vld [vmem:[%s1977_s18 + $0x30] sm:$0xff]   ;;  %v1773_v39 = vld [vmem:[%s1977_s18 + $0x38] sm:$0xff]   ;;  %v1774_v40 = vld [vmem:[%s1977_s18 + $0x40] sm:$0xff]  }
  0x15   : > { %991 = vmatprep.subr.bf16.mxu0 %v1787_v6  ;;  %v1823_v37 = vld [vmem:[%s2447_s3 + $0xd4] ss:$8 sps:$4 sm:$0xff]   ;;  %v1821_v38 = vld [vmem:[%s2447_s3 + $0xd0] ss:$8 sps:$4 sm:$0xff]   ;;  %v1775_v41 = vld [vmem:[%s1977_s18 + $0x48] sm:$0xff]   ;;  %v695_v55 = vunpack.c.0.s8 %v694_v53 }
  0x16   : > { %1740 = vmatpush1.bf16.msra.mxu1 %v1791_v13  ;;  %v1776_v42 = vld [vmem:[%s1977_s18 + $0x50] sm:$0xff]   ;;  %v1777_v43 = vld [vmem:[%s1977_s18 + $0x58] sm:$0xff]   ;;  %v1826_v44 = vld [vmem:[%s2447_s3 + $0xe4] ss:$8 sps:$4 sm:$0xff]  }
  0x17   : > { %1725 = vmatprep.subr.bf16.mxu1 %v1796_v16  ;;  %v1824_v45 = vld [vmem:[%s2447_s3 + $0xe0] ss:$8 sps:$4 sm:$0xff]   ;;  %v1829_v46 = vld [vmem:[%s2447_s3 + $0xf4] ss:$8 sps:$4 sm:$0xff]   ;;  %v1827_v47 = vld [vmem:[%s2447_s3 + $0xf0] ss:$8 sps:$4 sm:$0xff]   ;;  %v698_v58 = vsub.s32 %v695_v55, %v2113_v56 }
  0x18   : > { %992 = vmatpush1.bf16.msra.mxu0 %v1785_v7  ;;  %v1778_v48 = vld [vmem:[%s1977_s18 + $0x60] sm:$0xff]   ;;  %v1779_v49 = vld [vmem:[%s1977_s18 + $0x68] sm:$0xff]   ;;  %v1780_v50 = vld [vmem:[%s1977_s18 + $0x70] sm:$0xff]  }
  0x19   : > { %993 = vmatprep.subr.bf16.mxu0 %v1790_v9  ;;  %v1781_v51 = vld [vmem:[%s1977_s18 + $0x78] sm:$0xff]   ;;  %v1685_v57 = vld.sshfl [vmem:[%s2446_s2] sm:$0x11 pattern:$0x75316420] }
  0x1a   : > { %1741 = vmatpush1.bf16.msra.mxu1 %v1794_v15  ;;  %v692_v59 = vcombine.high %v1685_v57, %v1685_v57  ;;  %v699_v60 = vrot.slane %v1685_v57, %v698_v58 }
  0x1b   : > { %1670 = vmatmul.mubr.msk.bf16.gmra.mrb[4].mxu0 %vm409_vm0, %v1767_v12  ;;  %1726 = vmatprep.subr.bf16.mxu1 %v1799_v17 }
  0x1c   : > { %510 = vmatprep.mubr.bf16.mxu0 %v1902_v3  ;;  %994 = vmatpush1.bf16.msra.mxu0 %v1788_v10  ;;  %v706_v61 = vrot.slane %v692_v59, %v698_v58  ;;  %v708_v62 = vpack.i.b16 %v699_v60, %v699_v60 }
  0x1d   : > { %995 = vmatprep.subr.bf16.mxu0 %v1793_v11 }
  0x1e   : > { %1742 = vmatpush1.bf16.msra.mxu1 %v1797_v18  ;;  %v715_v0 = vpack.i.b16 %v706_v61, %v706_v61  ;;  %v2123_v4 = vrot.slane %v708_v62, %v2120_v63 }
  0x1f   : > { %1727 = vmatprep.subr.bf16.mxu1 %v1802_v19 }
  0x20   : > { %996 = vmatpush1.bf16.msra.mxu0 %v1791_v13  ;;  %v2126_v6 = vrot.slane %v715_v0, %v2120_v63 }
  0x21   : > { %997 = vmatprep.subr.bf16.mxu0 %v1796_v16 }
  0x22   : > { %1743 = vmatpush1.bf16.msra.mxu1 %v1800_v21 }
  0x23   : > { %1671 = vmatmul.mubr.msk.bf16.gmra.mrb[8].mxu0 %vm409_vm0, %v1768_v14  ;;  %1728 = vmatprep.subr.bf16.mxu1 %v1805_v22 }
  0x24   : > { %520 = vmatprep.mubr.bf16.mxu0 %v1902_v3  ;;  %998 = vmatpush1.bf16.msra.mxu0 %v1794_v15 }
  0x25   : > { %999 = vmatprep.subr.bf16.mxu0 %v1799_v17 }
  0x26   : > { %1744 = vmatpush1.bf16.msra.mxu1 %v1803_v23 }
  0x27   : > { %1729 = vmatprep.subr.bf16.mxu1 %v1808_v24 }
  0x28   : > { %1000 = vmatpush1.bf16.msra.mxu0 %v1797_v18 }
  0x29   : > { %1001 = vmatprep.subr.bf16.mxu0 %v1802_v19 }
  0x2a   : > { %1745 = vmatpush1.bf16.msra.mxu1 %v1806_v26 }
  0x2b   : > { %1672 = vmatmul.mubr.msk.bf16.gmra.mrb[12].mxu0 %vm409_vm0, %v1769_v20  ;;  %1730 = vmatprep.subr.bf16.mxu1 %v1811_v27 }
  0x2c   : > { %530 = vmatprep.mubr.bf16.mxu0 %v1902_v3  ;;  %1002 = vmatpush1.bf16.msra.mxu0 %v1800_v21 }
  0x2d   : > { %1003 = vmatprep.subr.bf16.mxu0 %v1805_v22 }
  0x2e   : > { %1746 = vmatpush1.bf16.msra.mxu1 %v1809_v28 }
  0x2f   : > { %1731 = vmatprep.subr.bf16.mxu1 %v1814_v29 }
  0x30   : > { %1004 = vmatpush1.bf16.msra.mxu0 %v1803_v23 }
  0x31   : > { %1005 = vmatprep.subr.bf16.mxu0 %v1808_v24 }
  0x32   : > { %1747 = vmatpush1.bf16.msra.mxu1 %v1812_v31 }
  0x33   : > { %1673 = vmatmul.mubr.msk.bf16.gmra.mrb[16].mxu0 %vm409_vm0, %v1770_v25  ;;  %1732 = vmatprep.subr.bf16.mxu1 %v1817_v32 }
  0x34   : > { %540 = vmatprep.mubr.bf16.mxu0 %v1902_v3  ;;  %1006 = vmatpush1.bf16.msra.mxu0 %v1806_v26 }
  0x35   : > { %1007 = vmatprep.subr.bf16.mxu0 %v1811_v27 }
  0x36   : > { %1748 = vmatpush1.bf16.msra.mxu1 %v1815_v33 }
  0x37   : > { %1733 = vmatprep.subr.bf16.mxu1 %v1820_v34 }
  0x38   : > { %1008 = vmatpush1.bf16.msra.mxu0 %v1809_v28 }
  0x39   : > { %1009 = vmatprep.subr.bf16.mxu0 %v1814_v29 }
  0x3a   : > { %1749 = vmatpush1.bf16.msra.mxu1 %v1818_v36 }
  0x3b   : > { %1674 = vmatmul.mubr.msk.bf16.gmra.mrb[20].mxu0 %vm409_vm0, %v1771_v30  ;;  %1734 = vmatprep.subr.bf16.mxu1 %v1823_v37 }
  0x3c   : > { %550 = vmatprep.mubr.bf16.mxu0 %v1902_v3  ;;  %1010 = vmatpush1.bf16.msra.mxu0 %v1812_v31 }
  0x3d   : > { %1011 = vmatprep.subr.bf16.mxu0 %v1817_v32 }
  0x3e   : > { %1750 = vmatpush1.bf16.msra.mxu1 %v1821_v38 }
  0x3f   : > { %1735 = vmatprep.subr.bf16.mxu1 %v1826_v44 }
  0x40   : > { %1012 = vmatpush1.bf16.msra.mxu0 %v1815_v33 }
  0x41   : > { %1013 = vmatprep.subr.bf16.mxu0 %v1820_v34 }
  0x42   : > { %1751 = vmatpush1.bf16.msra.mxu1 %v1824_v45 }
  0x43   : > { %1675 = vmatmul.mubr.msk.bf16.gmra.mrb[24].mxu0 %vm409_vm0, %v1772_v35  ;;  %1736 = vmatprep.subr.bf16.mxu1 %v1829_v46 }
  0x44   : > { %560 = vmatprep.mubr.bf16.mxu0 %v1902_v3  ;;  %1014 = vmatpush1.bf16.msra.mxu0 %v1818_v36 }
  0x45   : > { %1015 = vmatprep.subr.bf16.mxu0 %v1823_v37 }
  0x46   : > { %1752 = vmatpush1.bf16.msra.mxu1 %v1827_v47 }
  0x48   : > { %1016 = vmatpush1.bf16.msra.mxu0 %v1821_v38 }
  0x49   : > { %1017 = vmatprep.subr.bf16.mxu0 %v1826_v44 }
  0x4b   : > { %1676 = vmatmul.mubr.msk.bf16.gmra.mrb[28].mxu0 %vm409_vm0, %v1773_v39 }
  0x4c   : > { %570 = vmatprep.mubr.bf16.mxu0 %v1902_v3  ;;  %1018 = vmatpush1.bf16.msra.mxu0 %v1824_v45 }
  0x4d   : > { %1019 = vmatprep.subr.bf16.mxu0 %v1829_v46 }
  0x50   : > { %1020 = vmatpush1.bf16.msra.mxu0 %v1827_v47 }
  0x53   : > { %1677 = vmatmul.mubr.msk.bf16.gmra.mrb[32].mxu0 %vm409_vm0, %v1774_v40 }
  0x54   : > { %580 = vmatprep.mubr.bf16.mxu0 %v1902_v3 }
  0x5b   : > { %1678 = vmatmul.mubr.msk.bf16.gmra.mrb[36].mxu0 %vm409_vm0, %v1775_v41 }
  0x5c   : > { %590 = vmatprep.mubr.bf16.mxu0 %v1902_v3 }
  0x63   : > { %1679 = vmatmul.mubr.msk.bf16.gmra.mrb[40].mxu0 %vm409_vm0, %v1776_v42 }
  0x64   : > { %600 = vmatprep.mubr.bf16.mxu0 %v1902_v3 }
  0x6b   : > { %1680 = vmatmul.mubr.msk.bf16.gmra.mrb[44].mxu0 %vm409_vm0, %v1777_v43 }
  0x6c   : > { %610 = vmatprep.mubr.bf16.mxu0 %v1902_v3 }
  0x73   : > { %1681 = vmatmul.mubr.msk.bf16.gmra.mrb[48].mxu0 %vm409_vm0, %v1778_v48 }
  0x74   : > { %620 = vmatprep.mubr.bf16.mxu0 %v1902_v3 }
  0x7b   : > { %1682 = vmatmul.mubr.msk.bf16.gmra.mrb[52].mxu0 %vm409_vm0, %v1779_v49 }
  0x7c   : > { %630 = vmatprep.mubr.bf16.mxu0 %v1902_v3 }
  0x83   : > { %1683 = vmatmul.mubr.msk.bf16.gmra.mrb[56].mxu0 %vm409_vm0, %v1780_v50 }
  0x84   : > { %640 = vmatprep.mubr.bf16.mxu0 %v1902_v3 }
  0x8b   : > { %1684 = vmatmul.mubr.msk.bf16.gmra.mrb[60].mxu0 %vm409_vm0, %v1781_v51 }
  0xe6   : > { %v492_v1 = vpop.f32.mrb[0].mxu0 }
  0xe7   : > { %v494_v2 = vpop.f32.mrb[1].mxu0 }
  0xe8   : > { %v496_v5 = vpop.f32.mrb[2].mxu0 }
  0xe9   : > { %v651_v7 = vpack.c.bf16 %v496_v5, %v492_v1  ;;  %v498_v8 = vpop.f32.mrb[3].mxu0 }
  0xea   : > { %v652_v9 = vpack.c.bf16 %v498_v8, %v494_v2 }
  0xeb   : > { %v721_v10 = vadd.bf16 %v2123_v4, %v651_v7 }
  0xec   : > { %v722_v11 = vadd.bf16 %v2126_v6, %v652_v9 }
  0xed   : > { %v753_v14 = vmax.bf16 %v1902_v3, %v721_v10 }
  0xee   : > { %v502_v12 = vpop.f32.mrb[4].mxu0  ;;  %v754_v13 = vmax.bf16 %v1902_v3, %v722_v11 }
  0xef   : > { %v504_v15 = vpop.f32.mrb[5].mxu0 }
  0xf0   : > { %v506_v16 = vpop.f32.mrb[6].mxu0  ;;  %1021 = vmatprep.mubr.bf16.mxu0 %v754_v13 }
  0xf1   : > { %v653_v17 = vpack.c.bf16 %v506_v16, %v502_v12  ;;  %v508_v18 = vpop.f32.mrb[7].mxu0  ;;  %1022 = vmatmul.mubr.bf16.vlgmr.msra.gmra.mrb[64].mxu0 %v753_v14 }
  0xf2   : > { %v654_v19 = vpack.c.bf16 %v508_v18, %v504_v15 }
  0xf3   : > { %v723_v20 = vadd.bf16 %v2123_v4, %v653_v17 }
  0xf4   : > { %v724_v21 = vadd.bf16 %v2126_v6, %v654_v19 }
  0xf5   : > { %v755_v25 = vmax.bf16 %v1902_v3, %v723_v20 }
  0xf6   : > { %v512_v22 = vpop.f32.mrb[8].mxu0  ;;  %v756_v23 = vmax.bf16 %v1902_v3, %v724_v21 }
  0xf7   : > { %v514_v24 = vpop.f32.mrb[9].mxu0 }
  0xf8   : > { %v516_v26 = vpop.f32.mrb[10].mxu0  ;;  %1031 = vmatprep.mubr.bf16.mxu0 %v756_v23 }
  0xf9   : > { %v655_v27 = vpack.c.bf16 %v516_v26, %v512_v22  ;;  %v518_v28 = vpop.f32.mrb[11].mxu0  ;;  %1032 = vmatmul.mubr.bf16.gmra.mrb[68].mxu0 %v755_v25 }
  0xfa   : > { %v656_v29 = vpack.c.bf16 %v518_v28, %v514_v24 }
  0xfb   : > { %v725_v30 = vadd.bf16 %v2123_v4, %v655_v27 }
  0xfc   : > { %v726_v31 = vadd.bf16 %v2126_v6, %v656_v29 }
  0xfd   : > { %v757_v35 = vmax.bf16 %v1902_v3, %v725_v30 }
  0xfe   : > { %v522_v32 = vpop.f32.mrb[12].mxu0  ;;  %v758_v33 = vmax.bf16 %v1902_v3, %v726_v31 }
  0xff   : > { %v524_v34 = vpop.f32.mrb[13].mxu0 }
 0x100   : > { %v526_v36 = vpop.f32.mrb[14].mxu0  ;;  %1041 = vmatprep.mubr.bf16.mxu0 %v758_v33 }
 0x101   : > { %v657_v37 = vpack.c.bf16 %v526_v36, %v522_v32  ;;  %v528_v38 = vpop.f32.mrb[15].mxu0  ;;  %1042 = vmatmul.mubr.bf16.gmra.mrb[72].mxu0 %v757_v35 }
 0x102   : > { %v658_v39 = vpack.c.bf16 %v528_v38, %v524_v34 }
 0x103   : > { %v727_v40 = vadd.bf16 %v2123_v4, %v657_v37 }
 0x104   : > { %v728_v41 = vadd.bf16 %v2126_v6, %v658_v39 }
 0x105   : > { %v759_v45 = vmax.bf16 %v1902_v3, %v727_v40 }
 0x106   : > { %v532_v42 = vpop.f32.mrb[16].mxu0  ;;  %v760_v43 = vmax.bf16 %v1902_v3, %v728_v41 }
 0x107   : > { %v534_v44 = vpop.f32.mrb[17].mxu0 }
 0x108   : > { %v536_v46 = vpop.f32.mrb[18].mxu0  ;;  %1051 = vmatprep.mubr.bf16.mxu1 %v760_v43 }
 0x109   : > { %v659_v47 = vpack.c.bf16 %v536_v46, %v532_v42  ;;  %v538_v48 = vpop.f32.mrb[19].mxu0  ;;  %1052 = vmatmul.mubr.bf16.vlgmr.msra.gmra.mrb[0].mxu1 %v759_v45 }
 0x10a   : > { %v660_v49 = vpack.c.bf16 %v538_v48, %v534_v44 }
 0x10b   : > { %v729_v50 = vadd.bf16 %v2123_v4, %v659_v47 }
 0x10c   : > { %v730_v51 = vadd.bf16 %v2126_v6, %v660_v49 }
 0x10d   : > { %v761_v55 = vmax.bf16 %v1902_v3, %v729_v50 }
 0x10e   : > { %v542_v52 = vpop.f32.mrb[20].mxu0  ;;  %v762_v53 = vmax.bf16 %v1902_v3, %v730_v51 }
 0x10f   : > { %v544_v54 = vpop.f32.mrb[21].mxu0 }
 0x110   : > { %v546_v57 = vpop.f32.mrb[22].mxu0  ;;  %1061 = vmatprep.mubr.bf16.mxu1 %v762_v53 }
 0x111   : > { %v661_v58 = vpack.c.bf16 %v546_v57, %v542_v52  ;;  %v548_v59 = vpop.f32.mrb[23].mxu0  ;;  %1062 = vmatmul.mubr.bf16.gmra.mrb[4].mxu1 %v761_v55 }
 0x112   : > { %v662_v60 = vpack.c.bf16 %v548_v59, %v544_v54 }
 0x113   : > { %v731_v61 = vadd.bf16 %v2123_v4, %v661_v58 }
 0x114   : > { %v732_v62 = vadd.bf16 %v2126_v6, %v662_v60 }
 0x115   : > { %v763_v5 = vmax.bf16 %v1902_v3, %v731_v61 }
 0x116   : > { %v552_v0 = vpop.f32.mrb[24].mxu0  ;;  %v764_v1 = vmax.bf16 %v1902_v3, %v732_v62 }
 0x117   : > { %v554_v2 = vpop.f32.mrb[25].mxu0 }
 0x118   : > { %v556_v7 = vpop.f32.mrb[26].mxu0  ;;  %1071 = vmatprep.mubr.bf16.mxu1 %v764_v1 }
 0x119   : > { %v663_v8 = vpack.c.bf16 %v556_v7, %v552_v0  ;;  %v558_v9 = vpop.f32.mrb[27].mxu0  ;;  %1072 = vmatmul.mubr.bf16.gmra.mrb[8].mxu1 %v763_v5 }
 0x11a   : > { %v664_v10 = vpack.c.bf16 %v558_v9, %v554_v2 }
 0x11b   : > { %v733_v11 = vadd.bf16 %v2123_v4, %v663_v8 }
 0x11c   : > { %v734_v12 = vadd.bf16 %v2126_v6, %v664_v10 }
 0x11d   : > { %v765_v16 = vmax.bf16 %v1902_v3, %v733_v11 }
 0x11e   : > { %v562_v13 = vpop.f32.mrb[28].mxu0  ;;  %v766_v14 = vmax.bf16 %v1902_v3, %v734_v12 }
 0x11f   : > { %v564_v15 = vpop.f32.mrb[29].mxu0 }
 0x120   : > { %v566_v17 = vpop.f32.mrb[30].mxu0  ;;  %1081 = vmatprep.mubr.bf16.mxu1 %v766_v14 }
 0x121   : > { %v665_v18 = vpack.c.bf16 %v566_v17, %v562_v13  ;;  %v568_v19 = vpop.f32.mrb[31].mxu0  ;;  %1082 = vmatmul.mubr.bf16.gmra.mrb[12].mxu1 %v765_v16 }
 0x122   : > { %v666_v20 = vpack.c.bf16 %v568_v19, %v564_v15 }
 0x123   : > { %v735_v21 = vadd.bf16 %v2123_v4, %v665_v18 }
 0x124   : > { %v736_v22 = vadd.bf16 %v2126_v6, %v666_v20 }
 0x125   : > { %v767_v26 = vmax.bf16 %v1902_v3, %v735_v21 }
 0x126   : > { %v572_v23 = vpop.f32.mrb[32].mxu0  ;;  %v768_v24 = vmax.bf16 %v1902_v3, %v736_v22 }
 0x127   : > { %v574_v25 = vpop.f32.mrb[33].mxu0 }
 0x128   : > { %v576_v27 = vpop.f32.mrb[34].mxu0  ;;  %1091 = vmatprep.mubr.bf16.mxu1 %v768_v24 }
 0x129   : > { %v667_v28 = vpack.c.bf16 %v576_v27, %v572_v23  ;;  %v578_v29 = vpop.f32.mrb[35].mxu0  ;;  %1092 = vmatmul.mubr.bf16.gmra.mrb[16].mxu1 %v767_v26 }
 0x12a   : > { %v668_v30 = vpack.c.bf16 %v578_v29, %v574_v25 }
 0x12b   : > { %v737_v31 = vadd.bf16 %v2123_v4, %v667_v28 }
 0x12c   : > { %v738_v32 = vadd.bf16 %v2126_v6, %v668_v30 }
 0x12d   : > { %v769_v36 = vmax.bf16 %v1902_v3, %v737_v31 }
 0x12e   : > { %v582_v33 = vpop.f32.mrb[36].mxu0  ;;  %v770_v34 = vmax.bf16 %v1902_v3, %v738_v32 }
 0x12f   : > { %v584_v35 = vpop.f32.mrb[37].mxu0 }
 0x130   : > { %v586_v37 = vpop.f32.mrb[38].mxu0  ;;  %1101 = vmatprep.mubr.bf16.mxu1 %v770_v34 }
 0x131   : > { %v669_v38 = vpack.c.bf16 %v586_v37, %v582_v33  ;;  %v588_v39 = vpop.f32.mrb[39].mxu0  ;;  %1102 = vmatmul.mubr.bf16.gmra.mrb[20].mxu1 %v769_v36 }
 0x132   : > { %v670_v40 = vpack.c.bf16 %v588_v39, %v584_v35 }
 0x133   : > { %v739_v41 = vadd.bf16 %v2123_v4, %v669_v38 }
 0x134   : > { %v740_v42 = vadd.bf16 %v2126_v6, %v670_v40 }
 0x135   : > { %v771_v46 = vmax.bf16 %v1902_v3, %v739_v41 }
 0x136   : > { %v592_v43 = vpop.f32.mrb[40].mxu0  ;;  %v772_v44 = vmax.bf16 %v1902_v3, %v740_v42 }
 0x137   : > { %v594_v45 = vpop.f32.mrb[41].mxu0 }
 0x138   : > { %v596_v47 = vpop.f32.mrb[42].mxu0  ;;  %1111 = vmatprep.mubr.bf16.mxu1 %v772_v44 }
 0x139   : > { %v671_v48 = vpack.c.bf16 %v596_v47, %v592_v43  ;;  %v598_v49 = vpop.f32.mrb[43].mxu0  ;;  %1112 = vmatmul.mubr.bf16.gmra.mrb[24].mxu1 %v771_v46  ;;  %v817_v46 = vld [vmem:[%s2448_s4] sm:$0x3]  ;;  %v825_v47 = vsub.s32 1, %v2113_v56 }
 0x13a   : > { %v672_v50 = vpack.c.bf16 %v598_v49, %v594_v45 }
 0x13b   : > { %v741_v51 = vadd.bf16 %v2123_v4, %v671_v48  ;;  %v2197_v48 = vrot.slane %v817_v46, %v2120_v63  ;;  %v2199_v49 = vrot.slane %v817_v46, %v825_v47 }
 0x13c   : > { %v742_v52 = vadd.bf16 %v2126_v6, %v672_v50 }
 0x13d   : > { %v773_v57 = vmax.bf16 %v1902_v3, %v741_v51 }
 0x13e   : > { %v602_v53 = vpop.f32.mrb[44].mxu0  ;;  %v774_v54 = vmax.bf16 %v1902_v3, %v742_v52 }
 0x13f   : > { %v604_v55 = vpop.f32.mrb[45].mxu0 }
 0x140   : > { %v606_v58 = vpop.f32.mrb[46].mxu0  ;;  %1121 = vmatprep.mubr.bf16.mxu1 %v774_v54 }
 0x141   : > { %v673_v59 = vpack.c.bf16 %v606_v58, %v602_v53  ;;  %v608_v60 = vpop.f32.mrb[47].mxu0  ;;  %1122 = vmatmul.mubr.bf16.gmra.mrb[28].mxu1 %v773_v57 }
 0x142   : > { %v674_v61 = vpack.c.bf16 %v608_v60, %v604_v55 }
 0x143   : > { %v743_v62 = vadd.bf16 %v2123_v4, %v673_v59 }
 0x144   : > { %v744_v0 = vadd.bf16 %v2126_v6, %v674_v61 }
 0x145   : > { %v775_v7 = vmax.bf16 %v1902_v3, %v743_v62 }
 0x146   : > { %v612_v1 = vpop.f32.mrb[48].mxu0  ;;  %v776_v2 = vmax.bf16 %v1902_v3, %v744_v0 }
 0x147   : > { %v614_v5 = vpop.f32.mrb[49].mxu0 }
 0x148   : > { %v616_v8 = vpop.f32.mrb[50].mxu0  ;;  %1131 = vmatprep.mubr.bf16.mxu1 %v776_v2 }
 0x149   : > { %v675_v9 = vpack.c.bf16 %v616_v8, %v612_v1  ;;  %v618_v10 = vpop.f32.mrb[51].mxu0  ;;  %1132 = vmatmul.mubr.bf16.gmra.mrb[32].mxu1 %v775_v7 }
 0x14a   : > { %v676_v11 = vpack.c.bf16 %v618_v10, %v614_v5 }
 0x14b   : > { %v745_v12 = vadd.bf16 %v2123_v4, %v675_v9 }
 0x14c   : > { %v746_v13 = vadd.bf16 %v2126_v6, %v676_v11 }
 0x14d   : > { %v777_v17 = vmax.bf16 %v1902_v3, %v745_v12 }
 0x14e   : > { %v622_v14 = vpop.f32.mrb[52].mxu0  ;;  %v778_v15 = vmax.bf16 %v1902_v3, %v746_v13 }
 0x14f   : > { %v624_v16 = vpop.f32.mrb[53].mxu0 }
 0x150   : > { %v626_v18 = vpop.f32.mrb[54].mxu0  ;;  %1141 = vmatprep.mubr.bf16.mxu1 %v778_v15 }
 0x151   : > { %v677_v19 = vpack.c.bf16 %v626_v18, %v622_v14  ;;  %v628_v20 = vpop.f32.mrb[55].mxu0  ;;  %1142 = vmatmul.mubr.bf16.gmra.mrb[36].mxu1 %v777_v17 }
 0x152   : > { %v678_v21 = vpack.c.bf16 %v628_v20, %v624_v16 }
 0x153   : > { %v747_v22 = vadd.bf16 %v2123_v4, %v677_v19 }
 0x154   : > { %v748_v23 = vadd.bf16 %v2126_v6, %v678_v21 }
 0x155   : > { %v779_v27 = vmax.bf16 %v1902_v3, %v747_v22 }
 0x156   : > { %v632_v24 = vpop.f32.mrb[56].mxu0  ;;  %v780_v25 = vmax.bf16 %v1902_v3, %v748_v23 }
 0x157   : > { %v634_v26 = vpop.f32.mrb[57].mxu0 }
 0x158   : > { %v636_v28 = vpop.f32.mrb[58].mxu0  ;;  %1151 = vmatprep.mubr.bf16.mxu1 %v780_v25 }
 0x159   : > { %v679_v29 = vpack.c.bf16 %v636_v28, %v632_v24  ;;  %v638_v30 = vpop.f32.mrb[59].mxu0  ;;  %1152 = vmatmul.mubr.bf16.gmra.mrb[40].mxu1 %v779_v27 }
 0x15a   : > { %v680_v31 = vpack.c.bf16 %v638_v30, %v634_v26 }
 0x15b   : > { %v749_v32 = vadd.bf16 %v2123_v4, %v679_v29 }
 0x15c   : > { %v750_v33 = vadd.bf16 %v2126_v6, %v680_v31 }
 0x15d   : > { %v781_v37 = vmax.bf16 %v1902_v3, %v749_v32 }
 0x15e   : > { %v642_v34 = vpop.f32.mrb[60].mxu0  ;;  %v782_v35 = vmax.bf16 %v1902_v3, %v750_v33 }
 0x15f   : > { %v644_v36 = vpop.f32.mrb[61].mxu0 }
 0x160   : > { %v646_v38 = vpop.f32.mrb[62].mxu0  ;;  %1161 = vmatprep.mubr.bf16.mxu1 %v782_v35 }
 0x161   : > { %v681_v39 = vpack.c.bf16 %v646_v38, %v642_v34  ;;  %v648_v40 = vpop.f32.mrb[63].mxu0  ;;  %1162 = vmatmul.mubr.bf16.gmra.mrb[44].mxu1 %v781_v37 }
 0x162   : > { %v682_v41 = vpack.c.bf16 %v648_v40, %v644_v36 }
 0x163   : > { %v751_v42 = vadd.bf16 %v2123_v4, %v681_v39  ;;  %v1246_v4 = vld [vmem:[%s2449_s5] sm:$0x3] }
 0x164   : > { %v752_v43 = vadd.bf16 %v2126_v6, %v682_v41  ;;  %v2208_v52 = vrot.slane %v1246_v4, %v825_v47 }
 0x165   : > { %v783_v45 = vmax.bf16 %v1902_v3, %v751_v42 }
 0x166   : > { %v784_v44 = vmax.bf16 %v1902_v3, %v752_v43  ;;  %v2205_v3 = vrot.slane %v1246_v4, %v2120_v63 }
 0x168   : > { %1171 = vmatprep.mubr.bf16.mxu1 %v784_v44 }
 0x169   : > { %1172 = vmatmul.mubr.bf16.gmra.mrb[48].mxu1 %v783_v45 }
 0x1c4   : > { %v1023_v6 = vpop.f32.mrb[64].mxu0 }
 0x1c5   : > { %v1024_v50 = vadd.f32 %v1023_v6, %v2197_v48  ;;  %v1025_v51 = vpop.f32.mrb[65].mxu0 }
 0x1c6   : > { %v1026_v56 = vadd.f32 %v1025_v51, %v2199_v49  ;;  %v1027_v53 = vpop.f32.mrb[66].mxu0 }
 0x1c7   : > { %v1182_v54 = vmax.f32 %v1024_v50, 0.0  ;;  %v1028_v55 = vadd.f32 %v1027_v53, %v2197_v48  ;;  %v1029_v57 = vpop.f32.mrb[67].mxu0 }
 0x1c8   : > { %v1183_v58 = vmax.f32 %v1026_v56, 0.0  ;;  %v1030_v59 = vadd.f32 %v1029_v57, %v2199_v49 }
 0x1c9   : > { %v1184_v60 = vmax.f32 %v1028_v55, 0.0  ;;  %v1258_v61 = vmul.f32 %v2205_v3, %v1182_v54 }
 0x1ca   : > { %v1185_v63 = vmax.f32 %v1030_v59, 0.0  ;;  %v1259_v62 = vmul.f32 %v2208_v52, %v1183_v58 }
 0x1cb   : > { %v1260_v0 = vmul.f32 %v2205_v3, %v1184_v60 }
 0x1cc   : > { %v1261_v1 = vmul.f32 %v2208_v52, %v1185_v63  ;;  %v1033_v2 = vpop.f32.mrb[68].mxu0  ;;  %v1322_v5 = vadd.f32 %v1259_v62, %v1258_v61 }
 0x1cd   : > { %v1034_v7 = vadd.f32 %v1033_v2, %v2197_v48  ;;  %v1035_v8 = vpop.f32.mrb[69].mxu0 }
 0x1ce   : > { %v1036_v9 = vadd.f32 %v1035_v8, %v2199_v49  ;;  %v1037_v10 = vpop.f32.mrb[70].mxu0  ;;  %1323 = vadd.xlane.f32.xlu0 %v1322_v5  ;;  %v1325_v11 = vadd.f32 %v1261_v1, %v1260_v0 }
 0x1cf   : > { %v1186_v12 = vmax.f32 %v1034_v7, 0.0  ;;  %v1038_v13 = vadd.f32 %v1037_v10, %v2197_v48  ;;  %v1039_v14 = vpop.f32.mrb[71].mxu0 }
 0x1d0   : > { %v1187_v15 = vmax.f32 %v1036_v9, 0.0  ;;  %v1040_v16 = vadd.f32 %v1039_v14, %v2199_v49 }
 0x1d1   : > { %v1188_v17 = vmax.f32 %v1038_v13, 0.0  ;;  %v1262_v18 = vmul.f32 %v2205_v3, %v1186_v12 }
 0x1d2   : > { %v1189_v19 = vmax.f32 %v1040_v16, 0.0  ;;  %1326 = vadd.xlane.f32.xlu0 %v1325_v11  ;;  %v1263_v20 = vmul.f32 %v2208_v52, %v1187_v15 }
 0x1d3   : > { %v1264_v21 = vmul.f32 %v2205_v3, %v1188_v17 }
 0x1d4   : > { %v1265_v22 = vmul.f32 %v2208_v52, %v1189_v19  ;;  %v1043_v23 = vpop.f32.mrb[72].mxu0  ;;  %v1328_v24 = vadd.f32 %v1263_v20, %v1262_v18 }
 0x1d5   : > { %v1044_v25 = vadd.f32 %v1043_v23, %v2197_v48  ;;  %v1045_v26 = vpop.f32.mrb[73].mxu0 }
 0x1d6   : > { %v1046_v27 = vadd.f32 %v1045_v26, %v2199_v49  ;;  %v1047_v28 = vpop.f32.mrb[74].mxu0  ;;  %1329 = vadd.xlane.f32.xlu1 %v1328_v24  ;;  %v1331_v29 = vadd.f32 %v1265_v22, %v1264_v21 }
 0x1d7   : > { %v1190_v30 = vmax.f32 %v1044_v25, 0.0  ;;  %v1048_v31 = vadd.f32 %v1047_v28, %v2197_v48  ;;  %v1049_v32 = vpop.f32.mrb[75].mxu0 }
 0x1d8   : > { %v1191_v33 = vmax.f32 %v1046_v27, 0.0  ;;  %v1050_v34 = vadd.f32 %v1049_v32, %v2199_v49 }
 0x1d9   : > { %v1266_v35 = vmul.f32 %v2205_v3, %v1190_v30  ;;  %v1192_v36 = vmax.f32 %v1048_v31, 0.0 }
 0x1da   : > { %v1267_v37 = vmul.f32 %v2208_v52, %v1191_v33  ;;  %v1193_v38 = vmax.f32 %v1050_v34, 0.0  ;;  %1332 = vadd.xlane.f32.xlu1 %v1331_v29 }
 0x1db   : > { %v1268_v39 = vmul.f32 %v2205_v3, %v1192_v36 }
 0x1dc   : > { %v1269_v40 = vmul.f32 %v2208_v52, %v1193_v38  ;;  %v1053_v41 = vpop.f32.mrb[0].mxu1  ;;  %v1334_v42 = vadd.f32 %v1267_v37, %v1266_v35 }
 0x1dd   : > { %v1054_v43 = vadd.f32 %v1053_v41, %v2197_v48  ;;  %v1055_v44 = vpop.f32.mrb[1].mxu1 }
 0x1de   : > { %v1056_v45 = vadd.f32 %v1055_v44, %v2199_v49  ;;  %v1057_v46 = vpop.f32.mrb[2].mxu1  ;;  %1335 = vadd.xlane.f32.xlu0 %v1334_v42  ;;  %v1337_v47 = vadd.f32 %v1269_v40, %v1268_v39 }
 0x1df   : > { %v1194_v4 = vmax.f32 %v1054_v43, 0.0  ;;  %v1058_v6 = vadd.f32 %v1057_v46, %v2197_v48  ;;  %v1059_v50 = vpop.f32.mrb[3].mxu1 }
 0x1e0   : > { %v1195_v51 = vmax.f32 %v1056_v45, 0.0  ;;  %v1060_v56 = vadd.f32 %v1059_v50, %v2199_v49  ;;  %1338 = vadd.xlane.f32.xlu1 %v1337_v47 }
 0x1e1   : > { %v1270_v53 = vmul.f32 %v2205_v3, %v1194_v4  ;;  %v1196_v54 = vmax.f32 %v1058_v6, 0.0 }
 0x1e2   : > { %v1271_v55 = vmul.f32 %v2208_v52, %v1195_v51  ;;  %v1197_v57 = vmax.f32 %v1060_v56, 0.0 }
 0x1e3   : > { %v1272_v58 = vmul.f32 %v2205_v3, %v1196_v54 }
 0x1e4   : > { %v1273_v59 = vmul.f32 %v2208_v52, %v1197_v57  ;;  %v1063_v60 = vpop.f32.mrb[4].mxu1  ;;  %v1340_v61 = vadd.f32 %v1271_v55, %v1270_v53 }
 0x1e5   : > { %v1064_v63 = vadd.f32 %v1063_v60, %v2197_v48  ;;  %v1065_v62 = vpop.f32.mrb[5].mxu1 }
 0x1e6   : > { %v1066_v0 = vadd.f32 %v1065_v62, %v2199_v49  ;;  %v1067_v1 = vpop.f32.mrb[6].mxu1  ;;  %1341 = vadd.xlane.f32.xlu0 %v1340_v61  ;;  %v1343_v2 = vadd.f32 %v1273_v59, %v1272_v58 }
 0x1e7   : > { %v1198_v5 = vmax.f32 %v1064_v63, 0.0  ;;  %v1068_v7 = vadd.f32 %v1067_v1, %v2197_v48  ;;  %v1069_v8 = vpop.f32.mrb[7].mxu1 }
 0x1e8   : > { %v1199_v9 = vmax.f32 %v1066_v0, 0.0  ;;  %v1070_v10 = vadd.f32 %v1069_v8, %v2199_v49  ;;  %1344 = vadd.xlane.f32.xlu1 %v1343_v2 }
 0x1e9   : > { %v1274_v11 = vmul.f32 %v2205_v3, %v1198_v5  ;;  %v1200_v12 = vmax.f32 %v1068_v7, 0.0 }
 0x1ea   : > { %v1275_v13 = vmul.f32 %v2208_v52, %v1199_v9  ;;  %v1201_v14 = vmax.f32 %v1070_v10, 0.0 }
 0x1eb   : > { %v1276_v15 = vmul.f32 %v2205_v3, %v1200_v12 }
 0x1ec   : > { %v1277_v16 = vmul.f32 %v2208_v52, %v1201_v14  ;;  %v1073_v17 = vpop.f32.mrb[8].mxu1  ;;  %v1346_v18 = vadd.f32 %v1275_v13, %v1274_v11 }
 0x1ed   : > { %v1074_v19 = vadd.f32 %v1073_v17, %v2197_v48  ;;  %v1075_v20 = vpop.f32.mrb[9].mxu1 }
 0x1ee   : > { %v1076_v21 = vadd.f32 %v1075_v20, %v2199_v49  ;;  %v1077_v22 = vpop.f32.mrb[10].mxu1  ;;  %1347 = vadd.xlane.f32.xlu0 %v1346_v18  ;;  %v1349_v23 = vadd.f32 %v1277_v16, %v1276_v15 }
 0x1ef   : > { %v1202_v24 = vmax.f32 %v1074_v19, 0.0  ;;  %v1078_v25 = vadd.f32 %v1077_v22, %v2197_v48  ;;  %v1079_v26 = vpop.f32.mrb[11].mxu1 }
 0x1f0   : > { %v1203_v27 = vmax.f32 %v1076_v21, 0.0  ;;  %v1080_v28 = vadd.f32 %v1079_v26, %v2199_v49  ;;  %1350 = vadd.xlane.f32.xlu1 %v1349_v23 }
 0x1f1   : > { %v1278_v29 = vmul.f32 %v2205_v3, %v1202_v24  ;;  %v1204_v30 = vmax.f32 %v1078_v25, 0.0 }
 0x1f2   : > { %v1279_v31 = vmul.f32 %v2208_v52, %v1203_v27  ;;  %v1205_v32 = vmax.f32 %v1080_v28, 0.0 }
 0x1f3   : > { %v1280_v33 = vmul.f32 %v2205_v3, %v1204_v30 }
 0x1f4   : > { %v1281_v34 = vmul.f32 %v2208_v52, %v1205_v32  ;;  %v1083_v35 = vpop.f32.mrb[12].mxu1  ;;  %v1352_v36 = vadd.f32 %v1279_v31, %v1278_v29 }
 0x1f5   : > { %v1084_v37 = vadd.f32 %v1083_v35, %v2197_v48  ;;  %v1085_v38 = vpop.f32.mrb[13].mxu1 }
 0x1f6   : > { %v1086_v39 = vadd.f32 %v1085_v38, %v2199_v49  ;;  %v1087_v40 = vpop.f32.mrb[14].mxu1  ;;  %1353 = vadd.xlane.f32.xlu0 %v1352_v36  ;;  %v1355_v41 = vadd.f32 %v1281_v34, %v1280_v33 }
 0x1f7   : > { %v1206_v42 = vmax.f32 %v1084_v37, 0.0  ;;  %v1088_v43 = vadd.f32 %v1087_v40, %v2197_v48  ;;  %v1089_v44 = vpop.f32.mrb[15].mxu1 }
 0x1f8   : > { %v1207_v45 = vmax.f32 %v1086_v39, 0.0  ;;  %v1090_v46 = vadd.f32 %v1089_v44, %v2199_v49  ;;  %1356 = vadd.xlane.f32.xlu1 %v1355_v41 }
 0x1f9   : > { %v1282_v47 = vmul.f32 %v2205_v3, %v1206_v42  ;;  %v1208_v4 = vmax.f32 %v1088_v43, 0.0 }
 0x1fa   : > { %v1283_v6 = vmul.f32 %v2208_v52, %v1207_v45  ;;  %v1209_v50 = vmax.f32 %v1090_v46, 0.0 }
 0x1fb   : > { %v1284_v51 = vmul.f32 %v2205_v3, %v1208_v4 }
 0x1fc   : > { %v1285_v56 = vmul.f32 %v2208_v52, %v1209_v50  ;;  %v1093_v53 = vpop.f32.mrb[16].mxu1  ;;  %v1358_v54 = vadd.f32 %v1283_v6, %v1282_v47 }
 0x1fd   : > { %v1094_v55 = vadd.f32 %v1093_v53, %v2197_v48  ;;  %v1095_v57 = vpop.f32.mrb[17].mxu1 }
 0x1fe   : > { %v1096_v58 = vadd.f32 %v1095_v57, %v2199_v49  ;;  %v1097_v59 = vpop.f32.mrb[18].mxu1  ;;  %1359 = vadd.xlane.f32.xlu0 %v1358_v54  ;;  %v1361_v60 = vadd.f32 %v1285_v56, %v1284_v51 }
 0x1ff   : > { %v1210_v61 = vmax.f32 %v1094_v55, 0.0  ;;  %v1098_v63 = vadd.f32 %v1097_v59, %v2197_v48  ;;  %v1099_v62 = vpop.f32.mrb[19].mxu1 }
 0x200   : > { %v1211_v0 = vmax.f32 %v1096_v58, 0.0  ;;  %v1100_v1 = vadd.f32 %v1099_v62, %v2199_v49  ;;  %1362 = vadd.xlane.f32.xlu1 %v1361_v60 }
 0x201   : > { %v1286_v2 = vmul.f32 %v2205_v3, %v1210_v61  ;;  %v1212_v5 = vmax.f32 %v1098_v63, 0.0 }
 0x202   : > { %v1287_v7 = vmul.f32 %v2208_v52, %v1211_v0  ;;  %v1213_v8 = vmax.f32 %v1100_v1, 0.0 }
 0x203   : > { %v1288_v9 = vmul.f32 %v2205_v3, %v1212_v5 }
 0x204   : > { %v1289_v10 = vmul.f32 %v2208_v52, %v1213_v8  ;;  %v1103_v11 = vpop.f32.mrb[20].mxu1  ;;  %v1364_v12 = vadd.f32 %v1287_v7, %v1286_v2 }
 0x205   : > { %v1104_v13 = vadd.f32 %v1103_v11, %v2197_v48  ;;  %v1105_v14 = vpop.f32.mrb[21].mxu1 }
 0x206   : > { %v1106_v15 = vadd.f32 %v1105_v14, %v2199_v49  ;;  %v1107_v16 = vpop.f32.mrb[22].mxu1  ;;  %1365 = vadd.xlane.f32.xlu0 %v1364_v12  ;;  %v1367_v17 = vadd.f32 %v1289_v10, %v1288_v9 }
 0x207   : > { %v1214_v18 = vmax.f32 %v1104_v13, 0.0  ;;  %v1108_v19 = vadd.f32 %v1107_v16, %v2197_v48  ;;  %v1109_v20 = vpop.f32.mrb[23].mxu1 }
 0x208   : > { %v1215_v21 = vmax.f32 %v1106_v15, 0.0  ;;  %v1110_v22 = vadd.f32 %v1109_v20, %v2199_v49  ;;  %1368 = vadd.xlane.f32.xlu1 %v1367_v17 }
 0x209   : > { %v1290_v23 = vmul.f32 %v2205_v3, %v1214_v18  ;;  %v1216_v24 = vmax.f32 %v1108_v19, 0.0 }
 0x20a   : > { %v1291_v25 = vmul.f32 %v2208_v52, %v1215_v21  ;;  %v1217_v26 = vmax.f32 %v1110_v22, 0.0 }
 0x20b   : > { %v1292_v27 = vmul.f32 %v2205_v3, %v1216_v24 }
 0x20c   : > { %v1293_v28 = vmul.f32 %v2208_v52, %v1217_v26  ;;  %v1113_v29 = vpop.f32.mrb[24].mxu1  ;;  %v1370_v30 = vadd.f32 %v1291_v25, %v1290_v23 }
 0x20d   : > { %v1114_v31 = vadd.f32 %v1113_v29, %v2197_v48  ;;  %v1115_v32 = vpop.f32.mrb[25].mxu1 }
 0x20e   : > { %v1116_v33 = vadd.f32 %v1115_v32, %v2199_v49  ;;  %v1117_v34 = vpop.f32.mrb[26].mxu1  ;;  %1371 = vadd.xlane.f32.xlu0 %v1370_v30  ;;  %v1373_v35 = vadd.f32 %v1293_v28, %v1292_v27 }
 0x20f   : > { %v1218_v36 = vmax.f32 %v1114_v31, 0.0  ;;  %v1118_v37 = vadd.f32 %v1117_v34, %v2197_v48  ;;  %v1119_v38 = vpop.f32.mrb[27].mxu1 }
 0x210   : > { %v1219_v39 = vmax.f32 %v1116_v33, 0.0  ;;  %v1120_v40 = vadd.f32 %v1119_v38, %v2199_v49  ;;  %1374 = vadd.xlane.f32.xlu1 %v1373_v35 }
 0x211   : > { %v1294_v41 = vmul.f32 %v2205_v3, %v1218_v36  ;;  %v1220_v42 = vmax.f32 %v1118_v37, 0.0 }
 0x212   : > { %v1295_v43 = vmul.f32 %v2208_v52, %v1219_v39  ;;  %v1221_v44 = vmax.f32 %v1120_v40, 0.0 }
 0x213   : > { %v1296_v45 = vmul.f32 %v2205_v3, %v1220_v42 }
 0x214   : > { %v1297_v46 = vmul.f32 %v2208_v52, %v1221_v44  ;;  %v1123_v47 = vpop.f32.mrb[28].mxu1  ;;  %v1376_v4 = vadd.f32 %v1295_v43, %v1294_v41 }
 0x215   : > { %v1124_v6 = vadd.f32 %v1123_v47, %v2197_v48  ;;  %v1125_v50 = vpop.f32.mrb[29].mxu1 }
 0x216   : > { %v1126_v51 = vadd.f32 %v1125_v50, %v2199_v49  ;;  %v1127_v56 = vpop.f32.mrb[30].mxu1  ;;  %1377 = vadd.xlane.f32.xlu0 %v1376_v4  ;;  %v1379_v53 = vadd.f32 %v1297_v46, %v1296_v45 }
 0x217   : > { %v1222_v54 = vmax.f32 %v1124_v6, 0.0  ;;  %v1128_v55 = vadd.f32 %v1127_v56, %v2197_v48  ;;  %v1129_v57 = vpop.f32.mrb[31].mxu1 }
 0x218   : > { %v1223_v58 = vmax.f32 %v1126_v51, 0.0  ;;  %v1130_v59 = vadd.f32 %v1129_v57, %v2199_v49  ;;  %1380 = vadd.xlane.f32.xlu1 %v1379_v53 }
 0x219   : > { %v1298_v60 = vmul.f32 %v2205_v3, %v1222_v54  ;;  %v1224_v61 = vmax.f32 %v1128_v55, 0.0 }
 0x21a   : > { %v1299_v63 = vmul.f32 %v2208_v52, %v1223_v58  ;;  %v1225_v62 = vmax.f32 %v1130_v59, 0.0 }
 0x21b   : > { %v1300_v0 = vmul.f32 %v2205_v3, %v1224_v61 }
 0x21c   : > { %v1301_v1 = vmul.f32 %v2208_v52, %v1225_v62  ;;  %v1133_v2 = vpop.f32.mrb[32].mxu1  ;;  %v1382_v5 = vadd.f32 %v1299_v63, %v1298_v60 }
 0x21d   : > { %v1134_v7 = vadd.f32 %v1133_v2, %v2197_v48  ;;  %v1135_v8 = vpop.f32.mrb[33].mxu1 }
 0x21e   : > { %v1136_v9 = vadd.f32 %v1135_v8, %v2199_v49  ;;  %v1137_v10 = vpop.f32.mrb[34].mxu1  ;;  %1383 = vadd.xlane.f32.xlu0 %v1382_v5  ;;  %v1385_v11 = vadd.f32 %v1301_v1, %v1300_v0 }
 0x21f   : > { %v1226_v12 = vmax.f32 %v1134_v7, 0.0  ;;  %v1138_v13 = vadd.f32 %v1137_v10, %v2197_v48  ;;  %v1139_v14 = vpop.f32.mrb[35].mxu1 }
 0x220   : > { %v1227_v15 = vmax.f32 %v1136_v9, 0.0  ;;  %v1140_v16 = vadd.f32 %v1139_v14, %v2199_v49  ;;  %1386 = vadd.xlane.f32.xlu1 %v1385_v11 }
 0x221   : > { %v1302_v17 = vmul.f32 %v2205_v3, %v1226_v12  ;;  %v1228_v18 = vmax.f32 %v1138_v13, 0.0 }
 0x222   : > { %v1303_v19 = vmul.f32 %v2208_v52, %v1227_v15  ;;  %v1229_v20 = vmax.f32 %v1140_v16, 0.0 }
 0x223   : > { %v1304_v21 = vmul.f32 %v2205_v3, %v1228_v18 }
 0x224   : > { %v1305_v22 = vmul.f32 %v2208_v52, %v1229_v20  ;;  %v1143_v23 = vpop.f32.mrb[36].mxu1  ;;  %v1388_v24 = vadd.f32 %v1303_v19, %v1302_v17 }
 0x225   : > { %v1144_v25 = vadd.f32 %v1143_v23, %v2197_v48  ;;  %v1145_v26 = vpop.f32.mrb[37].mxu1 }
 0x226   : > { %v1146_v27 = vadd.f32 %v1145_v26, %v2199_v49  ;;  %v1147_v28 = vpop.f32.mrb[38].mxu1  ;;  %1389 = vadd.xlane.f32.xlu0 %v1388_v24  ;;  %v1391_v29 = vadd.f32 %v1305_v22, %v1304_v21 }
 0x227   : > { %v1230_v30 = vmax.f32 %v1144_v25, 0.0  ;;  %v1148_v31 = vadd.f32 %v1147_v28, %v2197_v48  ;;  %v1149_v32 = vpop.f32.mrb[39].mxu1 }
 0x228   : > { %v1231_v33 = vmax.f32 %v1146_v27, 0.0  ;;  %v1150_v34 = vadd.f32 %v1149_v32, %v2199_v49  ;;  %1392 = vadd.xlane.f32.xlu1 %v1391_v29 }
 0x229   : > { %v1306_v35 = vmul.f32 %v2205_v3, %v1230_v30  ;;  %v1232_v36 = vmax.f32 %v1148_v31, 0.0 }
 0x22a   : > { %v1307_v37 = vmul.f32 %v2208_v52, %v1231_v33  ;;  %v1233_v38 = vmax.f32 %v1150_v34, 0.0 }
 0x22b   : > { %v1308_v39 = vmul.f32 %v2205_v3, %v1232_v36 }
 0x22c   : > { %v1309_v40 = vmul.f32 %v2208_v52, %v1233_v38  ;;  %v1153_v41 = vpop.f32.mrb[40].mxu1  ;;  %v1394_v42 = vadd.f32 %v1307_v37, %v1306_v35 }
 0x22d   : > { %v1154_v43 = vadd.f32 %v1153_v41, %v2197_v48  ;;  %v1155_v44 = vpop.f32.mrb[41].mxu1 }
 0x22e   : > { %v1156_v45 = vadd.f32 %v1155_v44, %v2199_v49  ;;  %v1157_v46 = vpop.f32.mrb[42].mxu1  ;;  %1395 = vadd.xlane.f32.xlu0 %v1394_v42  ;;  %v1397_v47 = vadd.f32 %v1309_v40, %v1308_v39 }
 0x22f   : > { %v1234_v4 = vmax.f32 %v1154_v43, 0.0  ;;  %v1158_v6 = vadd.f32 %v1157_v46, %v2197_v48  ;;  %v1159_v50 = vpop.f32.mrb[43].mxu1 }
 0x230   : > { %v1235_v51 = vmax.f32 %v1156_v45, 0.0  ;;  %v1160_v56 = vadd.f32 %v1159_v50, %v2199_v49  ;;  %1398 = vadd.xlane.f32.xlu1 %v1397_v47 }
 0x231   : > { %v1310_v53 = vmul.f32 %v2205_v3, %v1234_v4  ;;  %v1236_v54 = vmax.f32 %v1158_v6, 0.0 }
 0x232   : > { %v1311_v55 = vmul.f32 %v2208_v52, %v1235_v51  ;;  %v1237_v57 = vmax.f32 %v1160_v56, 0.0 }
 0x233   : > { %v1312_v58 = vmul.f32 %v2205_v3, %v1236_v54 }
 0x234   : > { %v1313_v59 = vmul.f32 %v2208_v52, %v1237_v57  ;;  %v1163_v60 = vpop.f32.mrb[44].mxu1  ;;  %v1400_v61 = vadd.f32 %v1311_v55, %v1310_v53 }
 0x235   : > { %v1164_v63 = vadd.f32 %v1163_v60, %v2197_v48  ;;  %v1165_v62 = vpop.f32.mrb[45].mxu1 }
 0x236   : > { %v1166_v0 = vadd.f32 %v1165_v62, %v2199_v49  ;;  %v1167_v1 = vpop.f32.mrb[46].mxu1  ;;  %1401 = vadd.xlane.f32.xlu0 %v1400_v61  ;;  %v1403_v2 = vadd.f32 %v1313_v59, %v1312_v58 }
 0x237   : > { %v1238_v5 = vmax.f32 %v1164_v63, 0.0  ;;  %v1168_v7 = vadd.f32 %v1167_v1, %v2197_v48  ;;  %v1169_v8 = vpop.f32.mrb[47].mxu1 }
 0x238   : > { %v1239_v9 = vmax.f32 %v1166_v0, 0.0  ;;  %v1170_v10 = vadd.f32 %v1169_v8, %v2199_v49  ;;  %1404 = vadd.xlane.f32.xlu1 %v1403_v2 }
 0x239   : > { %v1314_v11 = vmul.f32 %v2205_v3, %v1238_v5  ;;  %v1240_v12 = vmax.f32 %v1168_v7, 0.0 }
 0x23a   : > { %v1315_v13 = vmul.f32 %v2208_v52, %v1239_v9  ;;  %v1241_v14 = vmax.f32 %v1170_v10, 0.0 }
 0x23b   : > { %v1316_v15 = vmul.f32 %v2205_v3, %v1240_v12 }
 0x23c   : > { %v1317_v16 = vmul.f32 %v2208_v52, %v1241_v14  ;;  %v1173_v17 = vpop.f32.mrb[48].mxu1  ;;  %v1406_v18 = vadd.f32 %v1315_v13, %v1314_v11 }
 0x23d   : > { %v1174_v19 = vadd.f32 %v1173_v17, %v2197_v48  ;;  %v1175_v20 = vpop.f32.mrb[49].mxu1 }
 0x23e   : > { %v1176_v21 = vadd.f32 %v1175_v20, %v2199_v49  ;;  %1407 = vadd.xlane.f32.xlu0 %v1406_v18  ;;  %v1177_v22 = vpop.f32.mrb[50].mxu1  ;;  %v1409_v23 = vadd.f32 %v1317_v16, %v1316_v15 }
 0x23f   : > { %v1242_v24 = vmax.f32 %v1174_v19, 0.0  ;;  %v1178_v25 = vadd.f32 %v1177_v22, %v2197_v48  ;;  %v1179_v26 = vpop.f32.mrb[51].mxu1  ;;  %v2337_v48 = vld [vmem:[#allocation2] ss:$0 sm:$0xff] }
 0x240   : > { %v1243_v27 = vmax.f32 %v1176_v21, 0.0  ;;  %v1180_v28 = vadd.f32 %v1179_v26, %v2199_v49  ;;  %1410 = vadd.xlane.f32.xlu1 %v1409_v23 }
 0x241   : > { %v1318_v29 = vmul.f32 %v2205_v3, %v1242_v24  ;;  %v1244_v30 = vmax.f32 %v1178_v25, 0.0 }
 0x242   : > { %v1319_v31 = vmul.f32 %v2208_v52, %v1243_v27  ;;  %v1245_v32 = vmax.f32 %v1180_v28, 0.0 }
 0x243   : > { %v1320_v33 = vmul.f32 %v2205_v3, %v1244_v30 }
 0x244   : > { %v1321_v34 = vmul.f32 %v2208_v52, %v1245_v32  ;;  %v1412_v35 = vadd.f32 %v1319_v31, %v1318_v29 }
 0x246   : > { %1413 = vadd.xlane.f32.xlu0 %v1412_v35  ;;  %v1415_v36 = vadd.f32 %v1321_v34, %v1320_v33 }
 0x248   : > { %1416 = vadd.xlane.f32.xlu1 %v1415_v36 }
 0x25b   : > { %v1324_v37 = vpop.xlane.xlu0 %1323 }
 0x25c   : > { %v1425_v49 = vadd.f32 %v2337_v48, %v1324_v37 }
 0x25e   : > { %1830 = vtanh.f32 %v1425_v49 }
 0x25f   : > { %v1327_v38 = vpop.xlane.xlu0 %1326 }
 0x260   : > { %v1426_v39 = vadd.f32 %v2337_v48, %v1327_v38 }
 0x262   : > { %1832 = vtanh.f32 %v1426_v39 }
 0x263   : > { %v1330_v40 = vpop.xlane.xlu1 %1329 }
 0x264   : > { %v1427_v3 = vadd.f32 %v2337_v48, %v1330_v40 }
 0x266   : > { %1834 = vtanh.f32 %v1427_v3 }
 0x267   : > { %v1333_v52 = vpop.xlane.xlu1 %1332 }
 0x268   : > { %v1831_v41 = vpop.eup %1830  ;;  %v1428_v42 = vadd.f32 %v2337_v48, %v1333_v52 }
 0x269   : > { %v1489_v43 = vmul.f32 0.48, %v1831_v41 }
 0x26a   : > { %1836 = vtanh.f32 %v1428_v42 }
 0x26b   : > { %v1521_v44 = vadd.f32 0.49, %v1489_v43  ;;  %v1336_v45 = vpop.xlane.xlu0 %1335 }
 0x26c   : > { %v1833_v46 = vpop.eup %1832  ;;  %v1429_v47 = vadd.f32 %v2337_v48, %v1336_v45 }
 0x26d   : > { %1554 = vst.msk [vmem:[%s2347_s22] sm:$0xff] %vm1553_vm1, %v1521_v44  ;;  %v1490_v4 = vmul.f32 0.48, %v1833_v46  ;;  %v1339_v6 = vpop.xlane.xlu1 %1338 }
 0x26e   : > { %1838 = vtanh.f32 %v1429_v47  ;;  %v1430_v50 = vadd.f32 %v2337_v48, %v1339_v6 }
 0x26f   : > { %v1522_v51 = vadd.f32 0.49, %v1490_v4 }
 0x270   : > { %v1835_v56 = vpop.eup %1834  ;;  %1840 = vtanh.f32 %v1430_v50 }
 0x271   : > { %1555 = vst.msk [vmem:[%s2347_s22 + $0x8] sm:$0xff] %vm1553_vm1, %v1522_v51  ;;  %v1491_v53 = vmul.f32 0.48, %v1835_v56 }
 0x273   : > { %v1523_v54 = vadd.f32 0.49, %v1491_v53  ;;  %v1342_v55 = vpop.xlane.xlu0 %1341 }
 0x274   : > { %v1837_v57 = vpop.eup %1836  ;;  %v1431_v58 = vadd.f32 %v2337_v48, %v1342_v55 }
 0x275   : > { %1556 = vst.msk [vmem:[%s2347_s22 + $0x10] sm:$0xff] %vm1553_vm1, %v1523_v54  ;;  %v1492_v59 = vmul.f32 0.48, %v1837_v57  ;;  %v1345_v60 = vpop.xlane.xlu1 %1344 }
 0x276   : > { %1842 = vtanh.f32 %v1431_v58  ;;  %v1432_v61 = vadd.f32 %v2337_v48, %v1345_v60 }
 0x277   : > { %v1524_v63 = vadd.f32 0.49, %v1492_v59 }
 0x278   : > { %v1839_v62 = vpop.eup %1838  ;;  %1844 = vtanh.f32 %v1432_v61 }
 0x279   : > { %1557 = vst.msk [vmem:[%s2347_s22 + $0x18] sm:$0xff] %vm1553_vm1, %v1524_v63  ;;  %v1493_v0 = vmul.f32 0.48, %v1839_v62 }
 0x27a   : > { %v1841_v1 = vpop.eup %1840 }
 0x27b   : > { %v1525_v2 = vadd.f32 0.49, %v1493_v0  ;;  %v1494_v5 = vmul.f32 0.48, %v1841_v1  ;;  %v1348_v7 = vpop.xlane.xlu0 %1347 }
 0x27c   : > { %v1433_v8 = vadd.f32 %v2337_v48, %v1348_v7 }
 0x27d   : > { %1558 = vst.msk [vmem:[%s2347_s22 + $0x20] sm:$0xff] %vm1553_vm1, %v1525_v2  ;;  %v1526_v9 = vadd.f32 0.49, %v1494_v5  ;;  %v1351_v10 = vpop.xlane.xlu1 %1350 }
 0x27e   : > { %1846 = vtanh.f32 %v1433_v8  ;;  %v1434_v11 = vadd.f32 %v2337_v48, %v1351_v10 }
 0x27f   : > { %1559 = vst.msk [vmem:[%s2347_s22 + $0x28] sm:$0xff] %vm1553_vm1, %v1526_v9 }
 0x280   : > { %v1843_v12 = vpop.eup %1842  ;;  %1848 = vtanh.f32 %v1434_v11 }
 0x281   : > { %v1495_v13 = vmul.f32 0.48, %v1843_v12 }
 0x282   : > { %v1845_v14 = vpop.eup %1844 }
 0x283   : > { %v1527_v15 = vadd.f32 0.49, %v1495_v13  ;;  %v1496_v16 = vmul.f32 0.48, %v1845_v14  ;;  %v1354_v17 = vpop.xlane.xlu0 %1353 }
 0x284   : > { %v1435_v18 = vadd.f32 %v2337_v48, %v1354_v17 }
 0x285   : > { %1560 = vst.msk [vmem:[%s2347_s22 + $0x30] sm:$0xff] %vm1553_vm1, %v1527_v15  ;;  %v1528_v19 = vadd.f32 0.49, %v1496_v16  ;;  %v1357_v20 = vpop.xlane.xlu1 %1356 }
 0x286   : > { %1850 = vtanh.f32 %v1435_v18  ;;  %v1436_v21 = vadd.f32 %v2337_v48, %v1357_v20 }
 0x287   : > { %1561 = vst.msk [vmem:[%s2347_s22 + $0x38] sm:$0xff] %vm1553_vm1, %v1528_v19 }
 0x288   : > { %v1847_v22 = vpop.eup %1846  ;;  %1852 = vtanh.f32 %v1436_v21 }
 0x289   : > { %v1497_v23 = vmul.f32 0.48, %v1847_v22 }
 0x28a   : > { %v1849_v24 = vpop.eup %1848 }
 0x28b   : > { %v1529_v25 = vadd.f32 0.49, %v1497_v23  ;;  %v1498_v26 = vmul.f32 0.48, %v1849_v24  ;;  %v1360_v27 = vpop.xlane.xlu0 %1359 }
 0x28c   : > { %v1437_v28 = vadd.f32 %v2337_v48, %v1360_v27 }
 0x28d   : > { %1562 = vst.msk [vmem:[%s2347_s22 + $0x40] sm:$0xff] %vm1553_vm1, %v1529_v25  ;;  %v1530_v29 = vadd.f32 0.49, %v1498_v26  ;;  %v1363_v30 = vpop.xlane.xlu1 %1362 }
 0x28e   : > { %1854 = vtanh.f32 %v1437_v28  ;;  %v1438_v31 = vadd.f32 %v2337_v48, %v1363_v30 }
 0x28f   : > { %1563 = vst.msk [vmem:[%s2347_s22 + $0x48] sm:$0xff] %vm1553_vm1, %v1530_v29 }
 0x290   : > { %v1851_v32 = vpop.eup %1850  ;;  %1856 = vtanh.f32 %v1438_v31 }
 0x291   : > { %v1499_v33 = vmul.f32 0.48, %v1851_v32 }
 0x292   : > { %v1853_v34 = vpop.eup %1852 }
 0x293   : > { %v1531_v35 = vadd.f32 0.49, %v1499_v33  ;;  %v1500_v36 = vmul.f32 0.48, %v1853_v34  ;;  %v1366_v37 = vpop.xlane.xlu0 %1365 }
 0x294   : > { %v1439_v49 = vadd.f32 %v2337_v48, %v1366_v37 }
 0x295   : > { %1564 = vst.msk [vmem:[%s2347_s22 + $0x50] sm:$0xff] %vm1553_vm1, %v1531_v35  ;;  %v1532_v38 = vadd.f32 0.49, %v1500_v36  ;;  %v1369_v39 = vpop.xlane.xlu1 %1368 }
 0x296   : > { %1858 = vtanh.f32 %v1439_v49  ;;  %v1440_v40 = vadd.f32 %v2337_v48, %v1369_v39 }
 0x297   : > { %1565 = vst.msk [vmem:[%s2347_s22 + $0x58] sm:$0xff] %vm1553_vm1, %v1532_v38 }
 0x298   : > { %v1855_v3 = vpop.eup %1854  ;;  %1860 = vtanh.f32 %v1440_v40 }
 0x299   : > { %v1501_v52 = vmul.f32 0.48, %v1855_v3 }
 0x29a   : > { %v1857_v41 = vpop.eup %1856 }
 0x29b   : > { %v1533_v42 = vadd.f32 0.49, %v1501_v52  ;;  %v1502_v43 = vmul.f32 0.48, %v1857_v41  ;;  %v1372_v44 = vpop.xlane.xlu0 %1371 }
 0x29c   : > { %v1441_v45 = vadd.f32 %v2337_v48, %v1372_v44 }
 0x29d   : > { %1566 = vst.msk [vmem:[%s2347_s22 + $0x60] sm:$0xff] %vm1553_vm1, %v1533_v42  ;;  %v1534_v46 = vadd.f32 0.49, %v1502_v43  ;;  %v1375_v47 = vpop.xlane.xlu1 %1374 }
 0x29e   : > { %1862 = vtanh.f32 %v1441_v45  ;;  %v1442_v4 = vadd.f32 %v2337_v48, %v1375_v47 }
 0x29f   : > { %1567 = vst.msk [vmem:[%s2347_s22 + $0x68] sm:$0xff] %vm1553_vm1, %v1534_v46 }
 0x2a0   : > { %v1859_v6 = vpop.eup %1858  ;;  %1864 = vtanh.f32 %v1442_v4 }
 0x2a1   : > { %v1503_v50 = vmul.f32 0.48, %v1859_v6 }
 0x2a2   : > { %v1861_v51 = vpop.eup %1860 }
 0x2a3   : > { %v1535_v56 = vadd.f32 0.49, %v1503_v50  ;;  %v1504_v53 = vmul.f32 0.48, %v1861_v51  ;;  %v1378_v54 = vpop.xlane.xlu0 %1377 }
 0x2a4   : > { %v1443_v55 = vadd.f32 %v2337_v48, %v1378_v54 }
 0x2a5   : > { %1568 = vst.msk [vmem:[%s2347_s22 + $0x70] sm:$0xff] %vm1553_vm1, %v1535_v56  ;;  %v1536_v57 = vadd.f32 0.49, %v1504_v53  ;;  %v1381_v58 = vpop.xlane.xlu1 %1380 }
 0x2a6   : > { %1866 = vtanh.f32 %v1443_v55  ;;  %v1444_v59 = vadd.f32 %v2337_v48, %v1381_v58 }
 0x2a7   : > { %1569 = vst.msk [vmem:[%s2347_s22 + $0x78] sm:$0xff] %vm1553_vm1, %v1536_v57 }
 0x2a8   : > { %v1863_v60 = vpop.eup %1862  ;;  %1868 = vtanh.f32 %v1444_v59 }
 0x2a9   : > { %v1505_v61 = vmul.f32 0.48, %v1863_v60 }
 0x2aa   : > { %v1865_v63 = vpop.eup %1864 }
 0x2ab   : > { %v1537_v62 = vadd.f32 0.49, %v1505_v61  ;;  %v1506_v0 = vmul.f32 0.48, %v1865_v63  ;;  %v1384_v1 = vpop.xlane.xlu0 %1383 }
 0x2ac   : > { %v1445_v2 = vadd.f32 %v2337_v48, %v1384_v1 }
 0x2ad   : > { %1570 = vst.msk [vmem:[%s2347_s22 + $0x80] sm:$0xff] %vm1553_vm1, %v1537_v62  ;;  %v1538_v5 = vadd.f32 0.49, %v1506_v0  ;;  %v1387_v7 = vpop.xlane.xlu1 %1386 }
 0x2ae   : > { %1870 = vtanh.f32 %v1445_v2  ;;  %v1446_v8 = vadd.f32 %v2337_v48, %v1387_v7 }
 0x2af   : > { %1571 = vst.msk [vmem:[%s2347_s22 + $0x88] sm:$0xff] %vm1553_vm1, %v1538_v5 }
 0x2b0   : > { %v1867_v9 = vpop.eup %1866  ;;  %1872 = vtanh.f32 %v1446_v8 }
 0x2b1   : > { %v1507_v10 = vmul.f32 0.48, %v1867_v9 }
 0x2b2   : > { %v1869_v11 = vpop.eup %1868 }
 0x2b3   : > { %v1539_v12 = vadd.f32 0.49, %v1507_v10  ;;  %v1508_v13 = vmul.f32 0.48, %v1869_v11  ;;  %v1390_v14 = vpop.xlane.xlu0 %1389 }
 0x2b4   : > { %v1447_v15 = vadd.f32 %v2337_v48, %v1390_v14 }
 0x2b5   : > { %1572 = vst.msk [vmem:[%s2347_s22 + $0x90] sm:$0xff] %vm1553_vm1, %v1539_v12  ;;  %v1540_v16 = vadd.f32 0.49, %v1508_v13  ;;  %v1393_v17 = vpop.xlane.xlu1 %1392 }
 0x2b6   : > { %1874 = vtanh.f32 %v1447_v15  ;;  %v1448_v18 = vadd.f32 %v2337_v48, %v1393_v17 }
 0x2b7   : > { %1573 = vst.msk [vmem:[%s2347_s22 + $0x98] sm:$0xff] %vm1553_vm1, %v1540_v16 }
 0x2b8   : > { %v1871_v19 = vpop.eup %1870  ;;  %1876 = vtanh.f32 %v1448_v18 }
 0x2b9   : > { %v1509_v20 = vmul.f32 0.48, %v1871_v19 }
 0x2ba   : > { %v1873_v21 = vpop.eup %1872 }
 0x2bb   : > { %v1541_v22 = vadd.f32 0.49, %v1509_v20  ;;  %v1510_v23 = vmul.f32 0.48, %v1873_v21  ;;  %v1396_v24 = vpop.xlane.xlu0 %1395 }
 0x2bc   : > { %v1449_v25 = vadd.f32 %v2337_v48, %v1396_v24 }
 0x2bd   : > { %1574 = vst.msk [vmem:[%s2347_s22 + $0xa0] sm:$0xff] %vm1553_vm1, %v1541_v22  ;;  %v1542_v26 = vadd.f32 0.49, %v1510_v23  ;;  %v1399_v27 = vpop.xlane.xlu1 %1398 }
 0x2be   : > { %1878 = vtanh.f32 %v1449_v25  ;;  %v1450_v28 = vadd.f32 %v2337_v48, %v1399_v27 }
 0x2bf   : > { %1575 = vst.msk [vmem:[%s2347_s22 + $0xa8] sm:$0xff] %vm1553_vm1, %v1542_v26 }
 0x2c0   : > { %v1875_v29 = vpop.eup %1874  ;;  %1880 = vtanh.f32 %v1450_v28 }
 0x2c1   : > { %v1511_v30 = vmul.f32 0.48, %v1875_v29 }
 0x2c2   : > { %v1877_v31 = vpop.eup %1876 }
 0x2c3   : > { %v1543_v32 = vadd.f32 0.49, %v1511_v30  ;;  %v1512_v33 = vmul.f32 0.48, %v1877_v31  ;;  %v1402_v34 = vpop.xlane.xlu0 %1401 }
 0x2c4   : > { %v1451_v35 = vadd.f32 %v2337_v48, %v1402_v34 }
 0x2c5   : > { %1576 = vst.msk [vmem:[%s2347_s22 + $0xb0] sm:$0xff] %vm1553_vm1, %v1543_v32  ;;  %v1544_v36 = vadd.f32 0.49, %v1512_v33  ;;  %v1405_v37 = vpop.xlane.xlu1 %1404 }
 0x2c6   : > { %1882 = vtanh.f32 %v1451_v35  ;;  %v1452_v49 = vadd.f32 %v2337_v48, %v1405_v37 }
 0x2c7   : > { %1577 = vst.msk [vmem:[%s2347_s22 + $0xb8] sm:$0xff] %vm1553_vm1, %v1544_v36 }
 0x2c8   : > { %v1879_v38 = vpop.eup %1878  ;;  %1884 = vtanh.f32 %v1452_v49 }
 0x2c9   : > { %v1513_v39 = vmul.f32 0.48, %v1879_v38 }
 0x2ca   : > { %v1881_v40 = vpop.eup %1880 }
 0x2cb   : > { %v1545_v3 = vadd.f32 0.49, %v1513_v39  ;;  %v1514_v52 = vmul.f32 0.48, %v1881_v40  ;;  %v1408_v41 = vpop.xlane.xlu0 %1407 }
 0x2cc   : > { %v1453_v42 = vadd.f32 %v2337_v48, %v1408_v41 }
 0x2cd   : > { %1578 = vst.msk [vmem:[%s2347_s22 + $0xc0] sm:$0xff] %vm1553_vm1, %v1545_v3  ;;  %v1546_v43 = vadd.f32 0.49, %v1514_v52  ;;  %v1411_v44 = vpop.xlane.xlu1 %1410 }
 0x2ce   : > { %1886 = vtanh.f32 %v1453_v42  ;;  %v1454_v45 = vadd.f32 %v2337_v48, %v1411_v44 }
 0x2cf   : > { %1579 = vst.msk [vmem:[%s2347_s22 + $0xc8] sm:$0xff] %vm1553_vm1, %v1546_v43 }
 0x2d0   : > { %v1883_v46 = vpop.eup %1882  ;;  %1888 = vtanh.f32 %v1454_v45 }
 0x2d1   : > { %v1515_v47 = vmul.f32 0.48, %v1883_v46 }
 0x2d2   : > { %v1885_v4 = vpop.eup %1884 }
 0x2d3   : > { %v1547_v6 = vadd.f32 0.49, %v1515_v47  ;;  %v1516_v50 = vmul.f32 0.48, %v1885_v4  ;;  %v1414_v51 = vpop.xlane.xlu0 %1413 }
 0x2d4   : > { %v1455_v56 = vadd.f32 %v2337_v48, %v1414_v51 }
 0x2d5   : > { %1580 = vst.msk [vmem:[%s2347_s22 + $0xd0] sm:$0xff] %vm1553_vm1, %v1547_v6  ;;  %v1548_v53 = vadd.f32 0.49, %v1516_v50  ;;  %v1417_v54 = vpop.xlane.xlu1 %1416 }
 0x2d6   : > { %1890 = vtanh.f32 %v1455_v56  ;;  %v1456_v55 = vadd.f32 %v2337_v48, %v1417_v54 }
 0x2d7   : > { %1581 = vst.msk [vmem:[%s2347_s22 + $0xd8] sm:$0xff] %vm1553_vm1, %v1548_v53 }
 0x2d8   : > { %v1887_v57 = vpop.eup %1886  ;;  %1892 = vtanh.f32 %v1456_v55 }
 0x2d9   : > { %v1517_v58 = vmul.f32 0.48, %v1887_v57 }
 0x2da   : > { %v1889_v59 = vpop.eup %1888 }
 0x2db   : > { %v1549_v60 = vadd.f32 0.49, %v1517_v58  ;;  %v1518_v61 = vmul.f32 0.48, %v1889_v59 }
 0x2dd   : > { %1582 = vst.msk [vmem:[%s2347_s22 + $0xe0] sm:$0xff] %vm1553_vm1, %v1549_v60  ;;  %v1550_v63 = vadd.f32 0.49, %v1518_v61 }
 0x2df   : > { %1583 = vst.msk [vmem:[%s2347_s22 + $0xe8] sm:$0xff] %vm1553_vm1, %v1550_v63 }
 0x2e0   : > { %v1891_v62 = vpop.eup %1890 }
 0x2e1   : > { %v1519_v0 = vmul.f32 0.48, %v1891_v62 }
 0x2e2   : > { %v1893_v1 = vpop.eup %1892 }
 0x2e3   : > { %v1551_v2 = vadd.f32 0.49, %v1519_v0  ;;  %v1520_v48 = vmul.f32 0.48, %v1893_v1 }
 0x2e5   : > { %1584 = vst.msk [vmem:[%s2347_s22 + $0xf0] sm:$0xff] %vm1553_vm1, %v1551_v2  ;;  %v1552_v5 = vadd.f32 0.49, %v1520_v48 }
 0x2e7   : > { %1585 = vst.msk [vmem:[%s2347_s22 + $0xf8] sm:$0xff] %vm1553_vm1, %v1552_v5 }
 0x2e8 PF: > { %s19_s26 = sadd.s32 1, %s1900_s26  }
 0x2e9   : > { %p16_p4 = scmp.ge.s32.totalorder %s19_s26, 4  }
 0x2eb   :  { %18 = sbr.rel (!%p16_p4) target bundleno = 3 (0x3), region = 78 }

</bundles_post_ra>
